<compile_context>
chip_gen: v7x
topology: tpu7x:2x2x1
jax: 0.10.0
libtpu: 0.0.40
codegen_flags: <defaults>
</compile_context>

<pallas_src>
import jax
import jax.numpy as jnp
from jax.experimental import pallas as pl
from jax.experimental.pallas import tpu as pltpu

PRIMITIVES = ('none', 'max_pool_3x3', 'avg_pool_3x3', 'skip_connect', 'dil_conv_3x3')
BN_EPS = 1e-5
_PAD_ROWS = 3   # dil-2 reach (2 rows) + 1 guard row so every +/-(2W+2) lane slice stays in-bounds


def _lane_coords(H, W):
    """(1, H*W) int32 flat index and column index from a single in-kernel iota."""
    HW = H * W
    flat = jax.lax.broadcasted_iota(jnp.int32, (1, HW), 1)
    if W & (W - 1) == 0:
        xcol = jnp.bitwise_and(flat, W - 1)
    else:
        # TODO(synk): non-power-of-two W (ImageNet 14x14 / 7x7 cells) takes a
        # vector integer division; correct but not tuned.
        xcol = flat - (flat // W) * W
    return flat, xcol


def _candidates(xpad_ref, center, dw_ref, pw_ref, *, H, W, use_bf16):
    """max_pool / avg_pool / (dil_conv -> 1x1) candidates for one image, each (C, H*W).

    xpad_ref: (C, (H+6)*W) VMEM halo scratch; lanes [3W, 3W+HW) hold the image.
              The 3 halo rows above/below are never initialised -- every tap
              that can reach them is masked below, so garbage never escapes.
    center:   (C, H*W) the image itself (already loaded by the caller).
    dw_ref:   (C, 9)  depthwise 3x3 dil=2 weights, ky*3+kx order.
    pw_ref:   (C, C)  pointwise 1x1 weights [c_out, c_in] (bf16 iff use_bf16).
    """
    HW = H * W
    base = _PAD_ROWS * W
    flat, xcol = _lane_coords(H, W)

    def tap(dy, dx):
        off = base + dy * W + dx
        return xpad_ref[:, off:off + HW]              # (C, HW) static lane-offset slice

    def valid(dy, dx):                                # (1, HW) bool: neighbour in-image
        conds = []
        if dy < 0:
            conds.append(flat >= (-dy) * W)
        if dy > 0:
            conds.append(flat < (H - dy) * W)
        if dx < 0:
            conds.append(xcol >= -dx)
        if dx > 0:
            conds.append(xcol <= W - 1 - dx)
        m = conds[0]
        for c in conds[1:]:
            m = jnp.logical_and(m, c)
        return m

    # -- max_pool_3x3 & avg_pool_3x3 (count_include_pad=False); the 8 shifted
    #    taps are shared between the two pools.
    mp = center
    sm = center
    for dy in (-1, 0, 1):
        for dx in (-1, 0, 1):
            if dy == 0 and dx == 0:
                continue
            t = tap(dy, dx)
            m = valid(dy, dx)
            mp = jnp.maximum(mp, jnp.where(m, t, -jnp.inf))
            sm = sm + jnp.where(m, t, 0.0)
    rowcnt = (1.0 + (flat >= W).astype(jnp.float32)
              + (flat < (H - 1) * W).astype(jnp.float32))
    colcnt = (1.0 + (xcol >= 1).astype(jnp.float32)
              + (xcol <= W - 2).astype(jnp.float32))
    rcnt = 1.0 / (rowcnt * colcnt)                    # exact valid-neighbour reciprocal, (1, HW)
    ap = sm * rcnt

    # -- dil_conv_3x3: ReLU -> depthwise 3x3 dil=2 pad=2 -> 1x1 conv
    dw = dw_ref[...]
    acc = dw[:, 4:5] * jnp.maximum(center, 0.0)       # centre weight k = 1*3+1
    k = 0
    for dy in (-2, 0, 2):
        for dx in (-2, 0, 2):
            if dy == 0 and dx == 0:
                k += 1
                continue
            t = jnp.where(valid(dy, dx), jnp.maximum(tap(dy, dx), 0.0), 0.0)
            acc = acc + dw[:, k:k + 1] * t
            k += 1

    pw = pw_ref[...]
    C = pw.shape[0]
    if C <= 8:
        # tiny channel counts: unrolled VPU outer-product beats a tiny MXU matmul
        pwo = pw[:, 0:1] * acc[0:1, :]
        for ci in range(1, C):
            pwo = pwo + pw[:, ci:ci + 1] * acc[ci:ci + 1, :]
    elif use_bf16:
        pwo = jnp.dot(pw, acc.astype(jnp.bfloat16), preferred_element_type=jnp.float32)
    else:
        pwo = jnp.dot(pw, acc, preferred_element_type=jnp.float32)
    return mp, ap, pwo


def _make_stats_kernel(H, W, use_bf16):
    HW = H * W
    base = _PAD_ROWS * W

    def kernel(x_ref, dw_ref, pw_ref, stats_ref, xpad_ref):
        xv = x_ref[0, :, :]
        xpad_ref[:, base:base + HW] = xv              # halo rows stay uninitialised (masked)
        mp, ap, pwo = _candidates(xpad_ref, xv, dw_ref, pw_ref,
                                  H=H, W=W, use_bf16=use_bf16)
        cols = [jnp.sum(mp, axis=-1, keepdims=True),
                jnp.sum(mp * mp, axis=-1, keepdims=True),
                jnp.sum(ap, axis=-1, keepdims=True),
                jnp.sum(ap * ap, axis=-1, keepdims=True),
                jnp.sum(pwo, axis=-1, keepdims=True),
                jnp.sum(pwo * pwo, axis=-1, keepdims=True)]
        # single fused (C, 6) store instead of six 1-lane read-modify-write stores
        C = xv.shape[0]
        lane = jax.lax.broadcasted_iota(jnp.int32, (C, 6), 1)
        st = jnp.zeros((C, 6), jnp.float32)
        for j, v in enumerate(cols):
            st = jnp.where(lane == j, v, st)
        stats_ref[0, :, :] = st

    return kernel


def _make_apply_kernel(H, W, use_bf16):
    HW = H * W
    base = _PAD_ROWS * W

    def kernel(x_ref, dw_ref, pw_ref, coef_ref, o_ref, xpad_ref):
        xv = x_ref[0, :, :]
        xpad_ref[:, base:base + HW] = xv
        mp, ap, pwo = _candidates(xpad_ref, xv, dw_ref, pw_ref,
                                  H=H, W=W, use_bf16=use_bf16)
        c = coef_ref[...]                             # (C, 5) folded BN/arch coefficients
        out = c[:, 3:4] + c[:, 4:5] * xv              # folded BN bias + w_skip * x
        out = out + c[:, 0:1] * mp
        out = out + c[:, 1:2] * ap
        out = out + c[:, 2:3] * pwo
        o_ref[0, :, :] = out                          # lane-dense (C, HW) single store

    return kernel


def mixed_op(x_nchw, weights, dw_w, pw_w):
    """MixedOp forward: sum_i weights[i] * op_i(x)  (training-mode batch-stat BN).
    x_nchw: (N,C,H,W) f32, weights: (5,) f32,
    dw_w: (C,1,3,3) depthwise dil-2 conv weight, pw_w: (C,C,1,1) pointwise weight."""
    N, C, H, W = x_nchw.shape
    HW = H * W
    Lin = (H + 2 * _PAD_ROWS) * W
    use_bf16 = C >= 64           # bf16 only where the MXU win is real and tolerance-safe

    # No jnp.pad HBM round-trip: kernels read the raw activation; the reshape is
    # metadata-only (row-major contiguity).
    x_flat = x_nchw.reshape(N, C, HW)
    dw_k = dw_w[:, 0].reshape(C, 9)                   # (C, ky*3+kx)
    pw_k = pw_w[:, :, 0, 0]                           # (C_out, C_in)
    if use_bf16:
        pw_k = pw_k.astype(jnp.bfloat16)              # hoisted cast: halves pw DMA + VMEM

    x_spec = pl.BlockSpec((1, C, HW), lambda n: (n, 0, 0))
    dw_spec = pl.BlockSpec((C, 9), lambda n: (0, 0))
    pw_spec = pl.BlockSpec((C, C), lambda n: (0, 0))
    scratch = [pltpu.VMEM((C, Lin), jnp.float32)]     # per-step halo buffer

    # Explicit VMEM budget only when the per-step footprint nears the default
    # scoped limit (large DARTS cells); capped under v7x's 64 MiB physical VMEM.
    per_step = 4 * (2 * C * HW          # double-buffered x block
                    + C * Lin           # halo scratch
                    + 2 * C * HW        # double-buffered output block (pass 2)
                    + 4 * C * HW        # live candidate temporaries
                    + 2 * (C * 9 + C * C))
    cp_kwargs = dict(dimension_semantics=("parallel",))
    if per_step * 3 > 24 * 1024 * 1024:
        cp_kwargs["vmem_limit_bytes"] = int(min(per_step * 3, 60 * 1024 * 1024))
    cparams = pltpu.CompilerParams(**cp_kwargs)

    # Pass 1: per-image, per-channel sum / sum-of-squares of the BN'd candidates.
    stats = pl.pallas_call(
        _make_stats_kernel(H, W, use_bf16),
        out_shape=jax.ShapeDtypeStruct((N, C, 6), jnp.float32),
        grid=(N,),
        in_specs=[x_spec, dw_spec, pw_spec],
        out_specs=pl.BlockSpec((1, C, 6), lambda n: (n, 0, 0)),
        scratch_shapes=scratch,
        compiler_params=cparams,
    )(x_flat, dw_k, pw_k)

    # Finalize BN stats and fold architecture weights into per-channel affine
    # coefficients (tiny (C,)-sized math, done once; 'none' contributes 0).
    # TODO(synk): E[x^2]-E[x]^2 in f32 can cancel at very large N*H*W; use a
    # shifted/compensated accumulation if used far outside DARTS shapes.
    sums = jnp.sum(stats, axis=0)                     # (C, 6)
    npix = jnp.float32(N * HW)
    mean = sums[:, 0::2] / npix                       # (C, 3): mp, ap, pw
    var = jnp.maximum(sums[:, 1::2] / npix - mean * mean, 0.0)
    rstd = jax.lax.rsqrt(var + BN_EPS)                # (C, 3)
    w_bn = jnp.stack([weights[1], weights[2], weights[4]])   # arch weights of BN'd ops
    scale = rstd * w_bn[None, :]                      # (C, 3)
    bias = -jnp.sum(scale * mean, axis=1, keepdims=True)     # (C, 1)
    w_skip = jnp.broadcast_to(weights[3], (C, 1))
    coef = jnp.concatenate([scale, bias, w_skip], axis=1).astype(jnp.float32)  # (C, 5)

    # Pass 2: recompute candidates, apply folded BN + weighted sum, write out.
    out = pl.pallas_call(
        _make_apply_kernel(H, W, use_bf16),
        out_shape=jax.ShapeDtypeStruct((N, C, HW), jnp.float32),
        grid=(N,),
        in_specs=[x_spec, dw_spec, pw_spec, pl.BlockSpec((C, 5), lambda n: (0, 0))],
        out_specs=pl.BlockSpec((1, C, HW), lambda n: (n, 0, 0)),
        scratch_shapes=scratch,
        compiler_params=cparams,
    )(x_flat, dw_k, pw_k, coef)

    return out.reshape(N, C, H, W)


def mixed_op_ref(x, weights, dw_w, pw_w):
    """Pure-JAX reference mirroring the PyTorch ops (independent of the kernel math)."""
    N, C, H, W = x.shape

    def bn(y):
        mean = jnp.mean(y, axis=(0, 2, 3), keepdims=True)
        var = jnp.mean((y - mean) ** 2, axis=(0, 2, 3), keepdims=True)
        return (y - mean) * jax.lax.rsqrt(var + BN_EPS)

    pad = [(0, 0), (0, 0), (1, 1), (1, 1)]
    outs = [jnp.zeros_like(x)]                                        # 'none'
    mp = jax.lax.reduce_window(x, -jnp.inf, jax.lax.max, (1, 1, 3, 3), (1, 1, 1, 1), pad)
    outs.append(bn(mp))                                               # max_pool + BN
    s = jax.lax.reduce_window(x, 0.0, jax.lax.add, (1, 1, 3, 3), (1, 1, 1, 1), pad)
    cnt = jax.lax.reduce_window(jnp.ones((1, 1, H, W), x.dtype), 0.0, jax.lax.add,
                                (1, 1, 3, 3), (1, 1, 1, 1), pad)
    outs.append(bn(s / cnt))                                          # avg_pool + BN
    outs.append(x)                                                    # skip_connect
    r = jax.nn.relu(x)
    dwc = jax.lax.conv_general_dilated(r, dw_w, (1, 1), ((2, 2), (2, 2)),
                                       rhs_dilation=(2, 2), feature_group_count=C,
                                       dimension_numbers=('NCHW', 'OIHW', 'NCHW'),
                                       precision=jax.lax.Precision.HIGHEST)
    pwc = jax.lax.conv_general_dilated(dwc, pw_w, (1, 1), 'VALID',
                                       dimension_numbers=('NCHW', 'OIHW', 'NCHW'),
                                       precision=jax.lax.Precision.HIGHEST)
    outs.append(bn(pwc))                                              # dil_conv_3x3
    return sum(w * o for w, o in zip(weights, outs))


if __name__ == "__main__":
    key = jax.random.PRNGKey(0)
    kx, kw, kdw, kpw = jax.random.split(key, 4)
    N, C, H, W = 2, 4, 16, 16

    x = jax.random.normal(kx, (N, C, H, W), jnp.float32)
    weights = jax.nn.softmax(jax.random.normal(kw, (len(PRIMITIVES),), jnp.float32))
    # deterministic parameter init (shapes from DilConv(C, C, 3, 1, 2, 2, affine=False))
    dw_w = jax.random.normal(kdw, (C, 1, 3, 3), jnp.float32) * 0.3
    pw_w = jax.random.normal(kpw, (C, C, 1, 1), jnp.float32) * 0.3

    out = jax.jit(mixed_op)(x, weights, dw_w, pw_w)
    out = jax.block_until_ready(out)

    ref = mixed_op_ref(x, weights, dw_w, pw_w)
    assert out.shape == (N, C, H, W), out.shape
    max_err = float(jnp.max(jnp.abs(out - ref)))
    assert max_err < 2e-3, f"max abs error {max_err}"
    print("KERNEL_OK")
</pallas_src>

<mosaic_0001>
module attributes {stable_mosaic.version = 11 : i64} {
  func.func @kernel(%arg0: i32, %arg1: memref<1x4x256xf32, #tpu.memory_space<vmem>>, %arg2: memref<4x9xf32, #tpu.memory_space<vmem>>, %arg3: memref<4x4xf32, #tpu.memory_space<vmem>>, %arg4: memref<1x4x6xf32, #tpu.memory_space<vmem>>, %arg5: memref<4x352xf32, #tpu.memory_space<vmem>>) attributes {dimension_semantics = [#tpu.dimension_semantics<parallel>], iteration_bounds = array<i64: 2>, scalar_prefetch = 0 : i64, scratch_operands = 1 : i64, tpu.core_type = #tpu.core_type<tc>, window_params = [{transform_indices = @transform_0, window_bounds = array<i64: 1, 4, 256>}, {pipeline_mode = #tpu.pipeline_mode<synchronous>, transform_indices = @transform_1, window_bounds = array<i64: 4, 9>}, {pipeline_mode = #tpu.pipeline_mode<synchronous>, transform_indices = @transform_2, window_bounds = array<i64: 4, 4>}, {transform_indices = @transform_3, window_bounds = array<i64: 1, 4, 6>}]} {
    %c0 = arith.constant 0 : index
    %c0_0 = arith.constant 0 : index
    %c0_1 = arith.constant 0 : index
    %0 = vector.load %arg1[%c0, %c0_0, %c0_1] : memref<1x4x256xf32, #tpu.memory_space<vmem>>, vector<1x4x256xf32>
    %1 = vector.shape_cast %0 : vector<1x4x256xf32> to vector<4x256xf32>
    %c0_2 = arith.constant 0 : index
    %c48 = arith.constant 48 : index
    %2 = vector.load %arg5[%c0_2, %c48] : memref<4x352xf32, #tpu.memory_space<vmem>>, vector<4x256xf32>
    tpu.vector_store %arg5[%c0_2, %c48], %1 {strides = array<i32>} : memref<4x352xf32, #tpu.memory_space<vmem>>, vector<4x256xf32>,
    %3 = tpu.iota {dimensions = array<i32: 1>} : vector<1x256xi32>
    %c15_i32 = arith.constant 15 : i32
    %4 = vector.broadcast %c15_i32 : i32 to vector<1x256xi32>
    %5 = arith.andi %3, %4 : vector<1x256xi32>
    %c0_3 = arith.constant 0 : index
    %c31 = arith.constant 31 : index
    %6 = vector.load %arg5[%c0_3, %c31] : memref<4x352xf32, #tpu.memory_space<vmem>>, vector<4x256xf32>
    %c16_i32 = arith.constant 16 : i32
    %7 = vector.broadcast %c16_i32 : i32 to vector<1x256xi32>
    %8 = arith.cmpi sge, %3, %7 : vector<1x256xi32>
    %c1_i32 = arith.constant 1 : i32
    %9 = vector.broadcast %c1_i32 : i32 to vector<1x256xi32>
    %10 = arith.cmpi sge, %5, %9 : vector<1x256xi32>
    %11 = arith.andi %8, %10 : vector<1x256xi1>
    %cst = arith.constant 0xFF800000 : f32
    %12 = vector.shape_cast %11 : vector<1x256xi1> to vector<1x256xi1>
    %13 = vector.broadcast %12 : vector<1x256xi1> to vector<4x256xi1>
    %14 = vector.broadcast %cst : f32 to vector<4x256xf32>
    %15 = arith.select %13, %6, %14 : vector<4x256xi1>, vector<4x256xf32>
    %16 = arith.maximumf %1, %15 : vector<4x256xf32>
    %cst_4 = arith.constant 0.000000e+00 : f32
    %17 = vector.shape_cast %11 : vector<1x256xi1> to vector<1x256xi1>
    %18 = vector.broadcast %17 : vector<1x256xi1> to vector<4x256xi1>
    %19 = vector.broadcast %cst_4 : f32 to vector<4x256xf32>
    %20 = arith.select %18, %6, %19 : vector<4x256xi1>, vector<4x256xf32>
    %21 = arith.addf %1, %20 : vector<4x256xf32>
    %c0_5 = arith.constant 0 : index
    %c32 = arith.constant 32 : index
    %22 = vector.load %arg5[%c0_5, %c32] : memref<4x352xf32, #tpu.memory_space<vmem>>, vector<4x256xf32>
    %c16_i32_6 = arith.constant 16 : i32
    %23 = vector.broadcast %c16_i32_6 : i32 to vector<1x256xi32>
    %24 = arith.cmpi sge, %3, %23 : vector<1x256xi32>
    %cst_7 = arith.constant 0xFF800000 : f32
    %25 = vector.shape_cast %24 : vector<1x256xi1> to vector<1x256xi1>
    %26 = vector.broadcast %25 : vector<1x256xi1> to vector<4x256xi1>
    %27 = vector.broadcast %cst_7 : f32 to vector<4x256xf32>
    %28 = arith.select %26, %22, %27 : vector<4x256xi1>, vector<4x256xf32>
    %29 = arith.maximumf %16, %28 : vector<4x256xf32>
    %cst_8 = arith.constant 0.000000e+00 : f32
    %30 = vector.shape_cast %24 : vector<1x256xi1> to vector<1x256xi1>
    %31 = vector.broadcast %30 : vector<1x256xi1> to vector<4x256xi1>
    %32 = vector.broadcast %cst_8 : f32 to vector<4x256xf32>
    %33 = arith.select %31, %22, %32 : vector<4x256xi1>, vector<4x256xf32>
    %34 = arith.addf %21, %33 : vector<4x256xf32>
    %c0_9 = arith.constant 0 : index
    %c33 = arith.constant 33 : index
    %35 = vector.load %arg5[%c0_9, %c33] : memref<4x352xf32, #tpu.memory_space<vmem>>, vector<4x256xf32>
    %c16_i32_10 = arith.constant 16 : i32
    %36 = vector.broadcast %c16_i32_10 : i32 to vector<1x256xi32>
    %37 = arith.cmpi sge, %3, %36 : vector<1x256xi32>
    %c14_i32 = arith.constant 14 : i32
    %38 = vector.broadcast %c14_i32 : i32 to vector<1x256xi32>
    %39 = arith.cmpi sle, %5, %38 : vector<1x256xi32>
    %40 = arith.andi %37, %39 : vector<1x256xi1>
    %cst_11 = arith.constant 0xFF800000 : f32
    %41 = vector.shape_cast %40 : vector<1x256xi1> to vector<1x256xi1>
    %42 = vector.broadcast %41 : vector<1x256xi1> to vector<4x256xi1>
    %43 = vector.broadcast %cst_11 : f32 to vector<4x256xf32>
    %44 = arith.select %42, %35, %43 : vector<4x256xi1>, vector<4x256xf32>
    %45 = arith.maximumf %29, %44 : vector<4x256xf32>
    %cst_12 = arith.constant 0.000000e+00 : f32
    %46 = vector.shape_cast %40 : vector<1x256xi1> to vector<1x256xi1>
    %47 = vector.broadcast %46 : vector<1x256xi1> to vector<4x256xi1>
    %48 = vector.broadcast %cst_12 : f32 to vector<4x256xf32>
    %49 = arith.select %47, %35, %48 : vector<4x256xi1>, vector<4x256xf32>
    %50 = arith.addf %34, %49 : vector<4x256xf32>
    %c0_13 = arith.constant 0 : index
    %c47 = arith.constant 47 : index
    %51 = vector.load %arg5[%c0_13, %c47] : memref<4x352xf32, #tpu.memory_space<vmem>>, vector<4x256xf32>
    %c1_i32_14 = arith.constant 1 : i32
    %52 = vector.broadcast %c1_i32_14 : i32 to vector<1x256xi32>
    %53 = arith.cmpi sge, %5, %52 : vector<1x256xi32>
    %cst_15 = arith.constant 0xFF800000 : f32
    %54 = vector.shape_cast %53 : vector<1x256xi1> to vector<1x256xi1>
    %55 = vector.broadcast %54 : vector<1x256xi1> to vector<4x256xi1>
    %56 = vector.broadcast %cst_15 : f32 to vector<4x256xf32>
    %57 = arith.select %55, %51, %56 : vector<4x256xi1>, vector<4x256xf32>
    %58 = arith.maximumf %45, %57 : vector<4x256xf32>
    %cst_16 = arith.constant 0.000000e+00 : f32
    %59 = vector.shape_cast %53 : vector<1x256xi1> to vector<1x256xi1>
    %60 = vector.broadcast %59 : vector<1x256xi1> to vector<4x256xi1>
    %61 = vector.broadcast %cst_16 : f32 to vector<4x256xf32>
    %62 = arith.select %60, %51, %61 : vector<4x256xi1>, vector<4x256xf32>
    %63 = arith.addf %50, %62 : vector<4x256xf32>
    %c0_17 = arith.constant 0 : index
    %c49 = arith.constant 49 : index
    %64 = vector.load %arg5[%c0_17, %c49] : memref<4x352xf32, #tpu.memory_space<vmem>>, vector<4x256xf32>
    %c14_i32_18 = arith.constant 14 : i32
    %65 = vector.broadcast %c14_i32_18 : i32 to vector<1x256xi32>
    %66 = arith.cmpi sle, %5, %65 : vector<1x256xi32>
    %cst_19 = arith.constant 0xFF800000 : f32
    %67 = vector.shape_cast %66 : vector<1x256xi1> to vector<1x256xi1>
    %68 = vector.broadcast %67 : vector<1x256xi1> to vector<4x256xi1>
    %69 = vector.broadcast %cst_19 : f32 to vector<4x256xf32>
    %70 = arith.select %68, %64, %69 : vector<4x256xi1>, vector<4x256xf32>
    %71 = arith.maximumf %58, %70 : vector<4x256xf32>
    %cst_20 = arith.constant 0.000000e+00 : f32
    %72 = vector.shape_cast %66 : vector<1x256xi1> to vector<1x256xi1>
    %73 = vector.broadcast %72 : vector<1x256xi1> to vector<4x256xi1>
    %74 = vector.broadcast %cst_20 : f32 to vector<4x256xf32>
    %75 = arith.select %73, %64, %74 : vector<4x256xi1>, vector<4x256xf32>
    %76 = arith.addf %63, %75 : vector<4x256xf32>
    %c0_21 = arith.constant 0 : index
    %c63 = arith.constant 63 : index
    %77 = vector.load %arg5[%c0_21, %c63] : memref<4x352xf32, #tpu.memory_space<vmem>>, vector<4x256xf32>
    %c240_i32 = arith.constant 240 : i32
    %78 = vector.broadcast %c240_i32 : i32 to vector<1x256xi32>
    %79 = arith.cmpi slt, %3, %78 : vector<1x256xi32>
    %c1_i32_22 = arith.constant 1 : i32
    %80 = vector.broadcast %c1_i32_22 : i32 to vector<1x256xi32>
    %81 = arith.cmpi sge, %5, %80 : vector<1x256xi32>
    %82 = arith.andi %79, %81 : vector<1x256xi1>
    %cst_23 = arith.constant 0xFF800000 : f32
    %83 = vector.shape_cast %82 : vector<1x256xi1> to vector<1x256xi1>
    %84 = vector.broadcast %83 : vector<1x256xi1> to vector<4x256xi1>
    %85 = vector.broadcast %cst_23 : f32 to vector<4x256xf32>
    %86 = arith.select %84, %77, %85 : vector<4x256xi1>, vector<4x256xf32>
    %87 = arith.maximumf %71, %86 : vector<4x256xf32>
    %cst_24 = arith.constant 0.000000e+00 : f32
    %88 = vector.shape_cast %82 : vector<1x256xi1> to vector<1x256xi1>
    %89 = vector.broadcast %88 : vector<1x256xi1> to vector<4x256xi1>
    %90 = vector.broadcast %cst_24 : f32 to vector<4x256xf32>
    %91 = arith.select %89, %77, %90 : vector<4x256xi1>, vector<4x256xf32>
    %92 = arith.addf %76, %91 : vector<4x256xf32>
    %c0_25 = arith.constant 0 : index
    %c64 = arith.constant 64 : index
    %93 = vector.load %arg5[%c0_25, %c64] : memref<4x352xf32, #tpu.memory_space<vmem>>, vector<4x256xf32>
    %c240_i32_26 = arith.constant 240 : i32
    %94 = vector.broadcast %c240_i32_26 : i32 to vector<1x256xi32>
    %95 = arith.cmpi slt, %3, %94 : vector<1x256xi32>
    %cst_27 = arith.constant 0xFF800000 : f32
    %96 = vector.shape_cast %95 : vector<1x256xi1> to vector<1x256xi1>
    %97 = vector.broadcast %96 : vector<1x256xi1> to vector<4x256xi1>
    %98 = vector.broadcast %cst_27 : f32 to vector<4x256xf32>
    %99 = arith.select %97, %93, %98 : vector<4x256xi1>, vector<4x256xf32>
    %100 = arith.maximumf %87, %99 : vector<4x256xf32>
    %cst_28 = arith.constant 0.000000e+00 : f32
    %101 = vector.shape_cast %95 : vector<1x256xi1> to vector<1x256xi1>
    %102 = vector.broadcast %101 : vector<1x256xi1> to vector<4x256xi1>
    %103 = vector.broadcast %cst_28 : f32 to vector<4x256xf32>
    %104 = arith.select %102, %93, %103 : vector<4x256xi1>, vector<4x256xf32>
    %105 = arith.addf %92, %104 : vector<4x256xf32>
    %c0_29 = arith.constant 0 : index
    %c65 = arith.constant 65 : index
    %106 = vector.load %arg5[%c0_29, %c65] : memref<4x352xf32, #tpu.memory_space<vmem>>, vector<4x256xf32>
    %c240_i32_30 = arith.constant 240 : i32
    %107 = vector.broadcast %c240_i32_30 : i32 to vector<1x256xi32>
    %108 = arith.cmpi slt, %3, %107 : vector<1x256xi32>
    %c14_i32_31 = arith.constant 14 : i32
    %109 = vector.broadcast %c14_i32_31 : i32 to vector<1x256xi32>
    %110 = arith.cmpi sle, %5, %109 : vector<1x256xi32>
    %111 = arith.andi %108, %110 : vector<1x256xi1>
    %cst_32 = arith.constant 0xFF800000 : f32
    %112 = vector.shape_cast %111 : vector<1x256xi1> to vector<1x256xi1>
    %113 = vector.broadcast %112 : vector<1x256xi1> to vector<4x256xi1>
    %114 = vector.broadcast %cst_32 : f32 to vector<4x256xf32>
    %115 = arith.select %113, %106, %114 : vector<4x256xi1>, vector<4x256xf32>
    %116 = arith.maximumf %100, %115 : vector<4x256xf32>
    %cst_33 = arith.constant 0.000000e+00 : f32
    %117 = vector.shape_cast %111 : vector<1x256xi1> to vector<1x256xi1>
    %118 = vector.broadcast %117 : vector<1x256xi1> to vector<4x256xi1>
    %119 = vector.broadcast %cst_33 : f32 to vector<4x256xf32>
    %120 = arith.select %118, %106, %119 : vector<4x256xi1>, vector<4x256xf32>
    %121 = arith.addf %105, %120 : vector<4x256xf32>
    %c16_i32_34 = arith.constant 16 : i32
    %122 = vector.broadcast %c16_i32_34 : i32 to vector<1x256xi32>
    %123 = arith.cmpi sge, %3, %122 : vector<1x256xi32>
    %124 = arith.extui %123 : vector<1x256xi1> to vector<1x256xi32>
    %125 = arith.sitofp %124 : vector<1x256xi32> to vector<1x256xf32>
    %cst_35 = arith.constant 1.000000e+00 : f32
    %126 = vector.broadcast %cst_35 : f32 to vector<1x256xf32>
    %127 = arith.addf %126, %125 : vector<1x256xf32>
    %c240_i32_36 = arith.constant 240 : i32
    %128 = vector.broadcast %c240_i32_36 : i32 to vector<1x256xi32>
    %129 = arith.cmpi slt, %3, %128 : vector<1x256xi32>
    %130 = arith.extui %129 : vector<1x256xi1> to vector<1x256xi32>
    %131 = arith.sitofp %130 : vector<1x256xi32> to vector<1x256xf32>
    %132 = arith.addf %127, %131 : vector<1x256xf32>
    %c1_i32_37 = arith.constant 1 : i32
    %133 = vector.broadcast %c1_i32_37 : i32 to vector<1x256xi32>
    %134 = arith.cmpi sge, %5, %133 : vector<1x256xi32>
    %135 = arith.extui %134 : vector<1x256xi1> to vector<1x256xi32>
    %136 = arith.sitofp %135 : vector<1x256xi32> to vector<1x256xf32>
    %cst_38 = arith.constant 1.000000e+00 : f32
    %137 = vector.broadcast %cst_38 : f32 to vector<1x256xf32>
    %138 = arith.addf %137, %136 : vector<1x256xf32>
    %c14_i32_39 = arith.constant 14 : i32
    %139 = vector.broadcast %c14_i32_39 : i32 to vector<1x256xi32>
    %140 = arith.cmpi sle, %5, %139 : vector<1x256xi32>
    %141 = arith.extui %140 : vector<1x256xi1> to vector<1x256xi32>
    %142 = arith.sitofp %141 : vector<1x256xi32> to vector<1x256xf32>
    %143 = arith.addf %138, %142 : vector<1x256xf32>
    %144 = arith.mulf %132, %143 : vector<1x256xf32>
    %cst_40 = arith.constant 1.000000e+00 : f32
    %145 = vector.broadcast %cst_40 : f32 to vector<1x256xf32>
    %146 = arith.divf %145, %144 : vector<1x256xf32>
    %147 = vector.broadcast %146 : vector<1x256xf32> to vector<4x256xf32>
    %148 = arith.mulf %121, %147 : vector<4x256xf32>
    %c0_41 = arith.constant 0 : index
    %c0_42 = arith.constant 0 : index
    %149 = vector.load %arg2[%c0_41, %c0_42] : memref<4x9xf32, #tpu.memory_space<vmem>>, vector<4x9xf32>
    %150 = vector.extract_strided_slice %149 {offsets = [0, 4], sizes = [4, 1], strides = [1, 1]} : vector<4x9xf32> to vector<4x1xf32>
    %cst_43 = arith.constant 0.000000e+00 : f32
    %151 = vector.broadcast %cst_43 : f32 to vector<4x256xf32>
    %152 = arith.maximumf %1, %151 : vector<4x256xf32>
    %153 = vector.broadcast %150 : vector<4x1xf32> to vector<4x256xf32>
    %154 = arith.mulf %153, %152 : vector<4x256xf32>
    %c32_i32 = arith.constant 32 : i32
    %155 = vector.broadcast %c32_i32 : i32 to vector<1x256xi32>
    %156 = arith.cmpi sge, %3, %155 : vector<1x256xi32>
    %c2_i32 = arith.constant 2 : i32
    %157 = vector.broadcast %c2_i32 : i32 to vector<1x256xi32>
    %158 = arith.cmpi sge, %5, %157 : vector<1x256xi32>
    %159 = arith.andi %156, %158 : vector<1x256xi1>
    %c0_44 = arith.constant 0 : index
    %c14 = arith.constant 14 : index
    %160 = vector.load %arg5[%c0_44, %c14] : memref<4x352xf32, #tpu.memory_space<vmem>>, vector<4x256xf32>
    %cst_45 = arith.constant 0.000000e+00 : f32
    %161 = vector.broadcast %cst_45 : f32 to vector<4x256xf32>
    %162 = arith.maximumf %160, %161 : vector<4x256xf32>
    %cst_46 = arith.constant 0.000000e+00 : f32
    %163 = vector.shape_cast %159 : vector<1x256xi1> to vector<1x256xi1>
    %164 = vector.broadcast %163 : vector<1x256xi1> to vector<4x256xi1>
    %165 = vector.broadcast %cst_46 : f32 to vector<4x256xf32>
    %166 = arith.select %164, %162, %165 : vector<4x256xi1>, vector<4x256xf32>
    %167 = vector.extract_strided_slice %149 {offsets = [0, 0], sizes = [4, 1], strides = [1, 1]} : vector<4x9xf32> to vector<4x1xf32>
    %168 = vector.broadcast %167 : vector<4x1xf32> to vector<4x256xf32>
    %169 = arith.mulf %168, %166 : vector<4x256xf32>
    %170 = arith.addf %154, %169 : vector<4x256xf32>
    %c32_i32_47 = arith.constant 32 : i32
    %171 = vector.broadcast %c32_i32_47 : i32 to vector<1x256xi32>
    %172 = arith.cmpi sge, %3, %171 : vector<1x256xi32>
    %c0_48 = arith.constant 0 : index
    %c16 = arith.constant 16 : index
    %173 = vector.load %arg5[%c0_48, %c16] : memref<4x352xf32, #tpu.memory_space<vmem>>, vector<4x256xf32>
    %cst_49 = arith.constant 0.000000e+00 : f32
    %174 = vector.broadcast %cst_49 : f32 to vector<4x256xf32>
    %175 = arith.maximumf %173, %174 : vector<4x256xf32>
    %cst_50 = arith.constant 0.000000e+00 : f32
    %176 = vector.shape_cast %172 : vector<1x256xi1> to vector<1x256xi1>
    %177 = vector.broadcast %176 : vector<1x256xi1> to vector<4x256xi1>
    %178 = vector.broadcast %cst_50 : f32 to vector<4x256xf32>
    %179 = arith.select %177, %175, %178 : vector<4x256xi1>, vector<4x256xf32>
    %180 = vector.extract_strided_slice %149 {offsets = [0, 1], sizes = [4, 1], strides = [1, 1]} : vector<4x9xf32> to vector<4x1xf32>
    %181 = vector.broadcast %180 : vector<4x1xf32> to vector<4x256xf32>
    %182 = arith.mulf %181, %179 : vector<4x256xf32>
    %183 = arith.addf %170, %182 : vector<4x256xf32>
    %c32_i32_51 = arith.constant 32 : i32
    %184 = vector.broadcast %c32_i32_51 : i32 to vector<1x256xi32>
    %185 = arith.cmpi sge, %3, %184 : vector<1x256xi32>
    %c13_i32 = arith.constant 13 : i32
    %186 = vector.broadcast %c13_i32 : i32 to vector<1x256xi32>
    %187 = arith.cmpi sle, %5, %186 : vector<1x256xi32>
    %188 = arith.andi %185, %187 : vector<1x256xi1>
    %c0_52 = arith.constant 0 : index
    %c18 = arith.constant 18 : index
    %189 = vector.load %arg5[%c0_52, %c18] : memref<4x352xf32, #tpu.memory_space<vmem>>, vector<4x256xf32>
    %cst_53 = arith.constant 0.000000e+00 : f32
    %190 = vector.broadcast %cst_53 : f32 to vector<4x256xf32>
    %191 = arith.maximumf %189, %190 : vector<4x256xf32>
    %cst_54 = arith.constant 0.000000e+00 : f32
    %192 = vector.shape_cast %188 : vector<1x256xi1> to vector<1x256xi1>
    %193 = vector.broadcast %192 : vector<1x256xi1> to vector<4x256xi1>
    %194 = vector.broadcast %cst_54 : f32 to vector<4x256xf32>
    %195 = arith.select %193, %191, %194 : vector<4x256xi1>, vector<4x256xf32>
    %196 = vector.extract_strided_slice %149 {offsets = [0, 2], sizes = [4, 1], strides = [1, 1]} : vector<4x9xf32> to vector<4x1xf32>
    %197 = vector.broadcast %196 : vector<4x1xf32> to vector<4x256xf32>
    %198 = arith.mulf %197, %195 : vector<4x256xf32>
    %199 = arith.addf %183, %198 : vector<4x256xf32>
    %c2_i32_55 = arith.constant 2 : i32
    %200 = vector.broadcast %c2_i32_55 : i32 to vector<1x256xi32>
    %201 = arith.cmpi sge, %5, %200 : vector<1x256xi32>
    %c0_56 = arith.constant 0 : index
    %c46 = arith.constant 46 : index
    %202 = vector.load %arg5[%c0_56, %c46] : memref<4x352xf32, #tpu.memory_space<vmem>>, vector<4x256xf32>
    %cst_57 = arith.constant 0.000000e+00 : f32
    %203 = vector.broadcast %cst_57 : f32 to vector<4x256xf32>
    %204 = arith.maximumf %202, %203 : vector<4x256xf32>
    %cst_58 = arith.constant 0.000000e+00 : f32
    %205 = vector.shape_cast %201 : vector<1x256xi1> to vector<1x256xi1>
    %206 = vector.broadcast %205 : vector<1x256xi1> to vector<4x256xi1>
    %207 = vector.broadcast %cst_58 : f32 to vector<4x256xf32>
    %208 = arith.select %206, %204, %207 : vector<4x256xi1>, vector<4x256xf32>
    %209 = vector.extract_strided_slice %149 {offsets = [0, 3], sizes = [4, 1], strides = [1, 1]} : vector<4x9xf32> to vector<4x1xf32>
    %210 = vector.broadcast %209 : vector<4x1xf32> to vector<4x256xf32>
    %211 = arith.mulf %210, %208 : vector<4x256xf32>
    %212 = arith.addf %199, %211 : vector<4x256xf32>
    %c13_i32_59 = arith.constant 13 : i32
    %213 = vector.broadcast %c13_i32_59 : i32 to vector<1x256xi32>
    %214 = arith.cmpi sle, %5, %213 : vector<1x256xi32>
    %c0_60 = arith.constant 0 : index
    %c50 = arith.constant 50 : index
    %215 = vector.load %arg5[%c0_60, %c50] : memref<4x352xf32, #tpu.memory_space<vmem>>, vector<4x256xf32>
    %cst_61 = arith.constant 0.000000e+00 : f32
    %216 = vector.broadcast %cst_61 : f32 to vector<4x256xf32>
    %217 = arith.maximumf %215, %216 : vector<4x256xf32>
    %cst_62 = arith.constant 0.000000e+00 : f32
    %218 = vector.shape_cast %214 : vector<1x256xi1> to vector<1x256xi1>
    %219 = vector.broadcast %218 : vector<1x256xi1> to vector<4x256xi1>
    %220 = vector.broadcast %cst_62 : f32 to vector<4x256xf32>
    %221 = arith.select %219, %217, %220 : vector<4x256xi1>, vector<4x256xf32>
    %222 = vector.extract_strided_slice %149 {offsets = [0, 5], sizes = [4, 1], strides = [1, 1]} : vector<4x9xf32> to vector<4x1xf32>
    %223 = vector.broadcast %222 : vector<4x1xf32> to vector<4x256xf32>
    %224 = arith.mulf %223, %221 : vector<4x256xf32>
    %225 = arith.addf %212, %224 : vector<4x256xf32>
    %c224_i32 = arith.constant 224 : i32
    %226 = vector.broadcast %c224_i32 : i32 to vector<1x256xi32>
    %227 = arith.cmpi slt, %3, %226 : vector<1x256xi32>
    %c2_i32_63 = arith.constant 2 : i32
    %228 = vector.broadcast %c2_i32_63 : i32 to vector<1x256xi32>
    %229 = arith.cmpi sge, %5, %228 : vector<1x256xi32>
    %230 = arith.andi %227, %229 : vector<1x256xi1>
    %c0_64 = arith.constant 0 : index
    %c78 = arith.constant 78 : index
    %231 = vector.load %arg5[%c0_64, %c78] : memref<4x352xf32, #tpu.memory_space<vmem>>, vector<4x256xf32>
    %cst_65 = arith.constant 0.000000e+00 : f32
    %232 = vector.broadcast %cst_65 : f32 to vector<4x256xf32>
    %233 = arith.maximumf %231, %232 : vector<4x256xf32>
    %cst_66 = arith.constant 0.000000e+00 : f32
    %234 = vector.shape_cast %230 : vector<1x256xi1> to vector<1x256xi1>
    %235 = vector.broadcast %234 : vector<1x256xi1> to vector<4x256xi1>
    %236 = vector.broadcast %cst_66 : f32 to vector<4x256xf32>
    %237 = arith.select %235, %233, %236 : vector<4x256xi1>, vector<4x256xf32>
    %238 = vector.extract_strided_slice %149 {offsets = [0, 6], sizes = [4, 1], strides = [1, 1]} : vector<4x9xf32> to vector<4x1xf32>
    %239 = vector.broadcast %238 : vector<4x1xf32> to vector<4x256xf32>
    %240 = arith.mulf %239, %237 : vector<4x256xf32>
    %241 = arith.addf %225, %240 : vector<4x256xf32>
    %c224_i32_67 = arith.constant 224 : i32
    %242 = vector.broadcast %c224_i32_67 : i32 to vector<1x256xi32>
    %243 = arith.cmpi slt, %3, %242 : vector<1x256xi32>
    %c0_68 = arith.constant 0 : index
    %c80 = arith.constant 80 : index
    %244 = vector.load %arg5[%c0_68, %c80] : memref<4x352xf32, #tpu.memory_space<vmem>>, vector<4x256xf32>
    %cst_69 = arith.constant 0.000000e+00 : f32
    %245 = vector.broadcast %cst_69 : f32 to vector<4x256xf32>
    %246 = arith.maximumf %244, %245 : vector<4x256xf32>
    %cst_70 = arith.constant 0.000000e+00 : f32
    %247 = vector.shape_cast %243 : vector<1x256xi1> to vector<1x256xi1>
    %248 = vector.broadcast %247 : vector<1x256xi1> to vector<4x256xi1>
    %249 = vector.broadcast %cst_70 : f32 to vector<4x256xf32>
    %250 = arith.select %248, %246, %249 : vector<4x256xi1>, vector<4x256xf32>
    %251 = vector.extract_strided_slice %149 {offsets = [0, 7], sizes = [4, 1], strides = [1, 1]} : vector<4x9xf32> to vector<4x1xf32>
    %252 = vector.broadcast %251 : vector<4x1xf32> to vector<4x256xf32>
    %253 = arith.mulf %252, %250 : vector<4x256xf32>
    %254 = arith.addf %241, %253 : vector<4x256xf32>
    %c224_i32_71 = arith.constant 224 : i32
    %255 = vector.broadcast %c224_i32_71 : i32 to vector<1x256xi32>
    %256 = arith.cmpi slt, %3, %255 : vector<1x256xi32>
    %c13_i32_72 = arith.constant 13 : i32
    %257 = vector.broadcast %c13_i32_72 : i32 to vector<1x256xi32>
    %258 = arith.cmpi sle, %5, %257 : vector<1x256xi32>
    %259 = arith.andi %256, %258 : vector<1x256xi1>
    %c0_73 = arith.constant 0 : index
    %c82 = arith.constant 82 : index
    %260 = vector.load %arg5[%c0_73, %c82] : memref<4x352xf32, #tpu.memory_space<vmem>>, vector<4x256xf32>
    %cst_74 = arith.constant 0.000000e+00 : f32
    %261 = vector.broadcast %cst_74 : f32 to vector<4x256xf32>
    %262 = arith.maximumf %260, %261 : vector<4x256xf32>
    %cst_75 = arith.constant 0.000000e+00 : f32
    %263 = vector.shape_cast %259 : vector<1x256xi1> to vector<1x256xi1>
    %264 = vector.broadcast %263 : vector<1x256xi1> to vector<4x256xi1>
    %265 = vector.broadcast %cst_75 : f32 to vector<4x256xf32>
    %266 = arith.select %264, %262, %265 : vector<4x256xi1>, vector<4x256xf32>
    %267 = vector.extract_strided_slice %149 {offsets = [0, 8], sizes = [4, 1], strides = [1, 1]} : vector<4x9xf32> to vector<4x1xf32>
    %268 = vector.broadcast %267 : vector<4x1xf32> to vector<4x256xf32>
    %269 = arith.mulf %268, %266 : vector<4x256xf32>
    %270 = arith.addf %254, %269 : vector<4x256xf32>
    %c0_76 = arith.constant 0 : index
    %c0_77 = arith.constant 0 : index
    %271 = vector.load %arg3[%c0_76, %c0_77] : memref<4x4xf32, #tpu.memory_space<vmem>>, vector<4x4xf32>
    %272 = vector.extract_strided_slice %271 {offsets = [0, 0], sizes = [4, 1], strides = [1, 1]} : vector<4x4xf32> to vector<4x1xf32>
    %273 = vector.extract_strided_slice %270 {offsets = [0, 0], sizes = [1, 256], strides = [1, 1]} : vector<4x256xf32> to vector<1x256xf32>
    %274 = vector.broadcast %272 : vector<4x1xf32> to vector<4x256xf32>
    %275 = vector.broadcast %273 : vector<1x256xf32> to vector<4x256xf32>
    %276 = arith.mulf %274, %275 : vector<4x256xf32>
    %277 = vector.extract_strided_slice %271 {offsets = [0, 1], sizes = [4, 1], strides = [1, 1]} : vector<4x4xf32> to vector<4x1xf32>
    %278 = vector.extract_strided_slice %270 {offsets = [1, 0], sizes = [1, 256], strides = [1, 1]} : vector<4x256xf32> to vector<1x256xf32>
    %279 = vector.broadcast %277 : vector<4x1xf32> to vector<4x256xf32>
    %280 = vector.broadcast %278 : vector<1x256xf32> to vector<4x256xf32>
    %281 = arith.mulf %279, %280 : vector<4x256xf32>
    %282 = arith.addf %276, %281 : vector<4x256xf32>
    %283 = vector.extract_strided_slice %271 {offsets = [0, 2], sizes = [4, 1], strides = [1, 1]} : vector<4x4xf32> to vector<4x1xf32>
    %284 = vector.extract_strided_slice %270 {offsets = [2, 0], sizes = [1, 256], strides = [1, 1]} : vector<4x256xf32> to vector<1x256xf32>
    %285 = vector.broadcast %283 : vector<4x1xf32> to vector<4x256xf32>
    %286 = vector.broadcast %284 : vector<1x256xf32> to vector<4x256xf32>
    %287 = arith.mulf %285, %286 : vector<4x256xf32>
    %288 = arith.addf %282, %287 : vector<4x256xf32>
    %289 = vector.extract_strided_slice %271 {offsets = [0, 3], sizes = [4, 1], strides = [1, 1]} : vector<4x4xf32> to vector<4x1xf32>
    %290 = vector.extract_strided_slice %270 {offsets = [3, 0], sizes = [1, 256], strides = [1, 1]} : vector<4x256xf32> to vector<1x256xf32>
    %291 = vector.broadcast %289 : vector<4x1xf32> to vector<4x256xf32>
    %292 = vector.broadcast %290 : vector<1x256xf32> to vector<4x256xf32>
    %293 = arith.mulf %291, %292 : vector<4x256xf32>
    %294 = arith.addf %288, %293 : vector<4x256xf32>
    %cst_78 = arith.constant dense<0.000000e+00> : vector<4xf32>
    %295 = vector.multi_reduction <add>, %116, %cst_78 [1] : vector<4x256xf32> to vector<4xf32>
    %296 = vector.shape_cast %295 : vector<4xf32> to vector<4x1xf32>
    %297 = arith.mulf %116, %116 : vector<4x256xf32>
    %cst_79 = arith.constant dense<0.000000e+00> : vector<4xf32>
    %298 = vector.multi_reduction <add>, %297, %cst_79 [1] : vector<4x256xf32> to vector<4xf32>
    %299 = vector.shape_cast %298 : vector<4xf32> to vector<4x1xf32>
    %cst_80 = arith.constant dense<0.000000e+00> : vector<4xf32>
    %300 = vector.multi_reduction <add>, %148, %cst_80 [1] : vector<4x256xf32> to vector<4xf32>
    %301 = vector.shape_cast %300 : vector<4xf32> to vector<4x1xf32>
    %302 = arith.mulf %148, %148 : vector<4x256xf32>
    %cst_81 = arith.constant dense<0.000000e+00> : vector<4xf32>
    %303 = vector.multi_reduction <add>, %302, %cst_81 [1] : vector<4x256xf32> to vector<4xf32>
    %304 = vector.shape_cast %303 : vector<4xf32> to vector<4x1xf32>
    %cst_82 = arith.constant dense<0.000000e+00> : vector<4xf32>
    %305 = vector.multi_reduction <add>, %294, %cst_82 [1] : vector<4x256xf32> to vector<4xf32>
    %306 = vector.shape_cast %305 : vector<4xf32> to vector<4x1xf32>
    %307 = arith.mulf %294, %294 : vector<4x256xf32>
    %cst_83 = arith.constant dense<0.000000e+00> : vector<4xf32>
    %308 = vector.multi_reduction <add>, %307, %cst_83 [1] : vector<4x256xf32> to vector<4xf32>
    %309 = vector.shape_cast %308 : vector<4xf32> to vector<4x1xf32>
    %310 = tpu.iota {dimensions = array<i32: 1>} : vector<4x6xi32>
    %cst_84 = arith.constant 0.000000e+00 : f32
    %311 = vector.broadcast %cst_84 : f32 to vector<4x6xf32>
    %c0_i32 = arith.constant 0 : i32
    %312 = vector.broadcast %c0_i32 : i32 to vector<4x6xi32>
    %313 = arith.cmpi eq, %310, %312 : vector<4x6xi32>
    %314 = vector.shape_cast %296 : vector<4x1xf32> to vector<4x1xf32>
    %315 = vector.broadcast %314 : vector<4x1xf32> to vector<4x6xf32>
    %316 = arith.select %313, %315, %311 : vector<4x6xi1>, vector<4x6xf32>
    %c1_i32_85 = arith.constant 1 : i32
    %317 = vector.broadcast %c1_i32_85 : i32 to vector<4x6xi32>
    %318 = arith.cmpi eq, %310, %317 : vector<4x6xi32>
    %319 = vector.shape_cast %299 : vector<4x1xf32> to vector<4x1xf32>
    %320 = vector.broadcast %319 : vector<4x1xf32> to vector<4x6xf32>
    %321 = arith.select %318, %320, %316 : vector<4x6xi1>, vector<4x6xf32>
    %c2_i32_86 = arith.constant 2 : i32
    %322 = vector.broadcast %c2_i32_86 : i32 to vector<4x6xi32>
    %323 = arith.cmpi eq, %310, %322 : vector<4x6xi32>
    %324 = vector.shape_cast %301 : vector<4x1xf32> to vector<4x1xf32>
    %325 = vector.broadcast %324 : vector<4x1xf32> to vector<4x6xf32>
    %326 = arith.select %323, %325, %321 : vector<4x6xi1>, vector<4x6xf32>
    %c3_i32 = arith.constant 3 : i32
    %327 = vector.broadcast %c3_i32 : i32 to vector<4x6xi32>
    %328 = arith.cmpi eq, %310, %327 : vector<4x6xi32>
    %329 = vector.shape_cast %304 : vector<4x1xf32> to vector<4x1xf32>
    %330 = vector.broadcast %329 : vector<4x1xf32> to vector<4x6xf32>
    %331 = arith.select %328, %330, %326 : vector<4x6xi1>, vector<4x6xf32>
    %c4_i32 = arith.constant 4 : i32
    %332 = vector.broadcast %c4_i32 : i32 to vector<4x6xi32>
    %333 = arith.cmpi eq, %310, %332 : vector<4x6xi32>
    %334 = vector.shape_cast %306 : vector<4x1xf32> to vector<4x1xf32>
    %335 = vector.broadcast %334 : vector<4x1xf32> to vector<4x6xf32>
    %336 = arith.select %333, %335, %331 : vector<4x6xi1>, vector<4x6xf32>
    %c5_i32 = arith.constant 5 : i32
    %337 = vector.broadcast %c5_i32 : i32 to vector<4x6xi32>
    %338 = arith.cmpi eq, %310, %337 : vector<4x6xi32>
    %339 = vector.shape_cast %309 : vector<4x1xf32> to vector<4x1xf32>
    %340 = vector.broadcast %339 : vector<4x1xf32> to vector<4x6xf32>
    %341 = arith.select %338, %340, %336 : vector<4x6xi1>, vector<4x6xf32>
    %c0_87 = arith.constant 0 : index
    %c0_88 = arith.constant 0 : index
    %c0_89 = arith.constant 0 : index
    %342 = vector.load %arg4[%c0_87, %c0_88, %c0_89] : memref<1x4x6xf32, #tpu.memory_space<vmem>>, vector<1x4x6xf32>
    %343 = vector.shape_cast %342 : vector<1x4x6xf32> to vector<4x6xf32>
    %344 = vector.shape_cast %341 : vector<4x6xf32> to vector<1x4x6xf32>
    tpu.vector_store %arg4[%c0_87, %c0_88, %c0_89], %344 {strides = array<i32>} : memref<1x4x6xf32, #tpu.memory_space<vmem>>, vector<1x4x6xf32>,
    return
  }
  func.func @transform_0(%arg0: i32) -> (i32, i32, i32) {
    %c0_i32 = arith.constant 0 : i32
    %c0_i32_0 = arith.constant 0 : i32
    %c0_i32_1 = arith.constant 0 : i32
    return %arg0, %c0_i32, %c0_i32_0 : i32, i32, i32
  }
  func.func @transform_1(%arg0: i32) -> (i32, i32) {
    %c0_i32 = arith.constant 0 : i32
    %c0_i32_0 = arith.constant 0 : i32
    %c0_i32_1 = arith.constant 0 : i32
    return %c0_i32, %c0_i32_0 : i32, i32
  }
  func.func @transform_2(%arg0: i32) -> (i32, i32) {
    %c0_i32 = arith.constant 0 : i32
    %c0_i32_0 = arith.constant 0 : i32
    %c0_i32_1 = arith.constant 0 : i32
    return %c0_i32, %c0_i32_0 : i32, i32
  }
  func.func @transform_3(%arg0: i32) -> (i32, i32, i32) {
    %c0_i32 = arith.constant 0 : i32
    %c0_i32_0 = arith.constant 0 : i32
    %c0_i32_1 = arith.constant 0 : i32
    return %arg0, %c0_i32, %c0_i32_0 : i32, i32, i32
  }
}

module attributes {stable_mosaic.version = 11 : i64} {
  func.func @kernel(%arg0: i32, %arg1: memref<1x4x256xf32, #tpu.memory_space<vmem>>, %arg2: memref<4x9xf32, #tpu.memory_space<vmem>>, %arg3: memref<4x4xf32, #tpu.memory_space<vmem>>, %arg4: memref<4x5xf32, #tpu.memory_space<vmem>>, %arg5: memref<1x4x256xf32, #tpu.memory_space<vmem>>, %arg6: memref<4x352xf32, #tpu.memory_space<vmem>>) attributes {dimension_semantics = [#tpu.dimension_semantics<parallel>], iteration_bounds = array<i64: 2>, scalar_prefetch = 0 : i64, scratch_operands = 1 : i64, tpu.core_type = #tpu.core_type<tc>, window_params = [{transform_indices = @transform_0, window_bounds = array<i64: 1, 4, 256>}, {pipeline_mode = #tpu.pipeline_mode<synchronous>, transform_indices = @transform_1, window_bounds = array<i64: 4, 9>}, {pipeline_mode = #tpu.pipeline_mode<synchronous>, transform_indices = @transform_2, window_bounds = array<i64: 4, 4>}, {pipeline_mode = #tpu.pipeline_mode<synchronous>, transform_indices = @transform_3, window_bounds = array<i64: 4, 5>}, {transform_indices = @transform_4, window_bounds = array<i64: 1, 4, 256>}]} {
    %c0 = arith.constant 0 : index
    %c0_0 = arith.constant 0 : index
    %c0_1 = arith.constant 0 : index
    %0 = vector.load %arg1[%c0, %c0_0, %c0_1] : memref<1x4x256xf32, #tpu.memory_space<vmem>>, vector<1x4x256xf32>
    %1 = vector.shape_cast %0 : vector<1x4x256xf32> to vector<4x256xf32>
    %c0_2 = arith.constant 0 : index
    %c48 = arith.constant 48 : index
    %2 = vector.load %arg6[%c0_2, %c48] : memref<4x352xf32, #tpu.memory_space<vmem>>, vector<4x256xf32>
    tpu.vector_store %arg6[%c0_2, %c48], %1 {strides = array<i32>} : memref<4x352xf32, #tpu.memory_space<vmem>>, vector<4x256xf32>,
    %3 = tpu.iota {dimensions = array<i32: 1>} : vector<1x256xi32>
    %c15_i32 = arith.constant 15 : i32
    %4 = vector.broadcast %c15_i32 : i32 to vector<1x256xi32>
    %5 = arith.andi %3, %4 : vector<1x256xi32>
    %c0_3 = arith.constant 0 : index
    %c31 = arith.constant 31 : index
    %6 = vector.load %arg6[%c0_3, %c31] : memref<4x352xf32, #tpu.memory_space<vmem>>, vector<4x256xf32>
    %c16_i32 = arith.constant 16 : i32
    %7 = vector.broadcast %c16_i32 : i32 to vector<1x256xi32>
    %8 = arith.cmpi sge, %3, %7 : vector<1x256xi32>
    %c1_i32 = arith.constant 1 : i32
    %9 = vector.broadcast %c1_i32 : i32 to vector<1x256xi32>
    %10 = arith.cmpi sge, %5, %9 : vector<1x256xi32>
    %11 = arith.andi %8, %10 : vector<1x256xi1>
    %cst = arith.constant 0xFF800000 : f32
    %12 = vector.shape_cast %11 : vector<1x256xi1> to vector<1x256xi1>
    %13 = vector.broadcast %12 : vector<1x256xi1> to vector<4x256xi1>
    %14 = vector.broadcast %cst : f32 to vector<4x256xf32>
    %15 = arith.select %13, %6, %14 : vector<4x256xi1>, vector<4x256xf32>
    %16 = arith.maximumf %1, %15 : vector<4x256xf32>
    %cst_4 = arith.constant 0.000000e+00 : f32
    %17 = vector.shape_cast %11 : vector<1x256xi1> to vector<1x256xi1>
    %18 = vector.broadcast %17 : vector<1x256xi1> to vector<4x256xi1>
    %19 = vector.broadcast %cst_4 : f32 to vector<4x256xf32>
    %20 = arith.select %18, %6, %19 : vector<4x256xi1>, vector<4x256xf32>
    %21 = arith.addf %1, %20 : vector<4x256xf32>
    %c0_5 = arith.constant 0 : index
    %c32 = arith.constant 32 : index
    %22 = vector.load %arg6[%c0_5, %c32] : memref<4x352xf32, #tpu.memory_space<vmem>>, vector<4x256xf32>
    %c16_i32_6 = arith.constant 16 : i32
    %23 = vector.broadcast %c16_i32_6 : i32 to vector<1x256xi32>
    %24 = arith.cmpi sge, %3, %23 : vector<1x256xi32>
    %cst_7 = arith.constant 0xFF800000 : f32
    %25 = vector.shape_cast %24 : vector<1x256xi1> to vector<1x256xi1>
    %26 = vector.broadcast %25 : vector<1x256xi1> to vector<4x256xi1>
    %27 = vector.broadcast %cst_7 : f32 to vector<4x256xf32>
    %28 = arith.select %26, %22, %27 : vector<4x256xi1>, vector<4x256xf32>
    %29 = arith.maximumf %16, %28 : vector<4x256xf32>
    %cst_8 = arith.constant 0.000000e+00 : f32
    %30 = vector.shape_cast %24 : vector<1x256xi1> to vector<1x256xi1>
    %31 = vector.broadcast %30 : vector<1x256xi1> to vector<4x256xi1>
    %32 = vector.broadcast %cst_8 : f32 to vector<4x256xf32>
    %33 = arith.select %31, %22, %32 : vector<4x256xi1>, vector<4x256xf32>
    %34 = arith.addf %21, %33 : vector<4x256xf32>
    %c0_9 = arith.constant 0 : index
    %c33 = arith.constant 33 : index
    %35 = vector.load %arg6[%c0_9, %c33] : memref<4x352xf32, #tpu.memory_space<vmem>>, vector<4x256xf32>
    %c16_i32_10 = arith.constant 16 : i32
    %36 = vector.broadcast %c16_i32_10 : i32 to vector<1x256xi32>
    %37 = arith.cmpi sge, %3, %36 : vector<1x256xi32>
    %c14_i32 = arith.constant 14 : i32
    %38 = vector.broadcast %c14_i32 : i32 to vector<1x256xi32>
    %39 = arith.cmpi sle, %5, %38 : vector<1x256xi32>
    %40 = arith.andi %37, %39 : vector<1x256xi1>
    %cst_11 = arith.constant 0xFF800000 : f32
    %41 = vector.shape_cast %40 : vector<1x256xi1> to vector<1x256xi1>
    %42 = vector.broadcast %41 : vector<1x256xi1> to vector<4x256xi1>
    %43 = vector.broadcast %cst_11 : f32 to vector<4x256xf32>
    %44 = arith.select %42, %35, %43 : vector<4x256xi1>, vector<4x256xf32>
    %45 = arith.maximumf %29, %44 : vector<4x256xf32>
    %cst_12 = arith.constant 0.000000e+00 : f32
    %46 = vector.shape_cast %40 : vector<1x256xi1> to vector<1x256xi1>
    %47 = vector.broadcast %46 : vector<1x256xi1> to vector<4x256xi1>
    %48 = vector.broadcast %cst_12 : f32 to vector<4x256xf32>
    %49 = arith.select %47, %35, %48 : vector<4x256xi1>, vector<4x256xf32>
    %50 = arith.addf %34, %49 : vector<4x256xf32>
    %c0_13 = arith.constant 0 : index
    %c47 = arith.constant 47 : index
    %51 = vector.load %arg6[%c0_13, %c47] : memref<4x352xf32, #tpu.memory_space<vmem>>, vector<4x256xf32>
    %c1_i32_14 = arith.constant 1 : i32
    %52 = vector.broadcast %c1_i32_14 : i32 to vector<1x256xi32>
    %53 = arith.cmpi sge, %5, %52 : vector<1x256xi32>
    %cst_15 = arith.constant 0xFF800000 : f32
    %54 = vector.shape_cast %53 : vector<1x256xi1> to vector<1x256xi1>
    %55 = vector.broadcast %54 : vector<1x256xi1> to vector<4x256xi1>
    %56 = vector.broadcast %cst_15 : f32 to vector<4x256xf32>
    %57 = arith.select %55, %51, %56 : vector<4x256xi1>, vector<4x256xf32>
    %58 = arith.maximumf %45, %57 : vector<4x256xf32>
    %cst_16 = arith.constant 0.000000e+00 : f32
    %59 = vector.shape_cast %53 : vector<1x256xi1> to vector<1x256xi1>
    %60 = vector.broadcast %59 : vector<1x256xi1> to vector<4x256xi1>
    %61 = vector.broadcast %cst_16 : f32 to vector<4x256xf32>
    %62 = arith.select %60, %51, %61 : vector<4x256xi1>, vector<4x256xf32>
    %63 = arith.addf %50, %62 : vector<4x256xf32>
    %c0_17 = arith.constant 0 : index
    %c49 = arith.constant 49 : index
    %64 = vector.load %arg6[%c0_17, %c49] : memref<4x352xf32, #tpu.memory_space<vmem>>, vector<4x256xf32>
    %c14_i32_18 = arith.constant 14 : i32
    %65 = vector.broadcast %c14_i32_18 : i32 to vector<1x256xi32>
    %66 = arith.cmpi sle, %5, %65 : vector<1x256xi32>
    %cst_19 = arith.constant 0xFF800000 : f32
    %67 = vector.shape_cast %66 : vector<1x256xi1> to vector<1x256xi1>
    %68 = vector.broadcast %67 : vector<1x256xi1> to vector<4x256xi1>
    %69 = vector.broadcast %cst_19 : f32 to vector<4x256xf32>
    %70 = arith.select %68, %64, %69 : vector<4x256xi1>, vector<4x256xf32>
    %71 = arith.maximumf %58, %70 : vector<4x256xf32>
    %cst_20 = arith.constant 0.000000e+00 : f32
    %72 = vector.shape_cast %66 : vector<1x256xi1> to vector<1x256xi1>
    %73 = vector.broadcast %72 : vector<1x256xi1> to vector<4x256xi1>
    %74 = vector.broadcast %cst_20 : f32 to vector<4x256xf32>
    %75 = arith.select %73, %64, %74 : vector<4x256xi1>, vector<4x256xf32>
    %76 = arith.addf %63, %75 : vector<4x256xf32>
    %c0_21 = arith.constant 0 : index
    %c63 = arith.constant 63 : index
    %77 = vector.load %arg6[%c0_21, %c63] : memref<4x352xf32, #tpu.memory_space<vmem>>, vector<4x256xf32>
    %c240_i32 = arith.constant 240 : i32
    %78 = vector.broadcast %c240_i32 : i32 to vector<1x256xi32>
    %79 = arith.cmpi slt, %3, %78 : vector<1x256xi32>
    %c1_i32_22 = arith.constant 1 : i32
    %80 = vector.broadcast %c1_i32_22 : i32 to vector<1x256xi32>
    %81 = arith.cmpi sge, %5, %80 : vector<1x256xi32>
    %82 = arith.andi %79, %81 : vector<1x256xi1>
    %cst_23 = arith.constant 0xFF800000 : f32
    %83 = vector.shape_cast %82 : vector<1x256xi1> to vector<1x256xi1>
    %84 = vector.broadcast %83 : vector<1x256xi1> to vector<4x256xi1>
    %85 = vector.broadcast %cst_23 : f32 to vector<4x256xf32>
    %86 = arith.select %84, %77, %85 : vector<4x256xi1>, vector<4x256xf32>
    %87 = arith.maximumf %71, %86 : vector<4x256xf32>
    %cst_24 = arith.constant 0.000000e+00 : f32
    %88 = vector.shape_cast %82 : vector<1x256xi1> to vector<1x256xi1>
    %89 = vector.broadcast %88 : vector<1x256xi1> to vector<4x256xi1>
    %90 = vector.broadcast %cst_24 : f32 to vector<4x256xf32>
    %91 = arith.select %89, %77, %90 : vector<4x256xi1>, vector<4x256xf32>
    %92 = arith.addf %76, %91 : vector<4x256xf32>
    %c0_25 = arith.constant 0 : index
    %c64 = arith.constant 64 : index
    %93 = vector.load %arg6[%c0_25, %c64] : memref<4x352xf32, #tpu.memory_space<vmem>>, vector<4x256xf32>
    %c240_i32_26 = arith.constant 240 : i32
    %94 = vector.broadcast %c240_i32_26 : i32 to vector<1x256xi32>
    %95 = arith.cmpi slt, %3, %94 : vector<1x256xi32>
    %cst_27 = arith.constant 0xFF800000 : f32
    %96 = vector.shape_cast %95 : vector<1x256xi1> to vector<1x256xi1>
    %97 = vector.broadcast %96 : vector<1x256xi1> to vector<4x256xi1>
    %98 = vector.broadcast %cst_27 : f32 to vector<4x256xf32>
    %99 = arith.select %97, %93, %98 : vector<4x256xi1>, vector<4x256xf32>
    %100 = arith.maximumf %87, %99 : vector<4x256xf32>
    %cst_28 = arith.constant 0.000000e+00 : f32
    %101 = vector.shape_cast %95 : vector<1x256xi1> to vector<1x256xi1>
    %102 = vector.broadcast %101 : vector<1x256xi1> to vector<4x256xi1>
    %103 = vector.broadcast %cst_28 : f32 to vector<4x256xf32>
    %104 = arith.select %102, %93, %103 : vector<4x256xi1>, vector<4x256xf32>
    %105 = arith.addf %92, %104 : vector<4x256xf32>
    %c0_29 = arith.constant 0 : index
    %c65 = arith.constant 65 : index
    %106 = vector.load %arg6[%c0_29, %c65] : memref<4x352xf32, #tpu.memory_space<vmem>>, vector<4x256xf32>
    %c240_i32_30 = arith.constant 240 : i32
    %107 = vector.broadcast %c240_i32_30 : i32 to vector<1x256xi32>
    %108 = arith.cmpi slt, %3, %107 : vector<1x256xi32>
    %c14_i32_31 = arith.constant 14 : i32
    %109 = vector.broadcast %c14_i32_31 : i32 to vector<1x256xi32>
    %110 = arith.cmpi sle, %5, %109 : vector<1x256xi32>
    %111 = arith.andi %108, %110 : vector<1x256xi1>
    %cst_32 = arith.constant 0xFF800000 : f32
    %112 = vector.shape_cast %111 : vector<1x256xi1> to vector<1x256xi1>
    %113 = vector.broadcast %112 : vector<1x256xi1> to vector<4x256xi1>
    %114 = vector.broadcast %cst_32 : f32 to vector<4x256xf32>
    %115 = arith.select %113, %106, %114 : vector<4x256xi1>, vector<4x256xf32>
    %116 = arith.maximumf %100, %115 : vector<4x256xf32>
    %cst_33 = arith.constant 0.000000e+00 : f32
    %117 = vector.shape_cast %111 : vector<1x256xi1> to vector<1x256xi1>
    %118 = vector.broadcast %117 : vector<1x256xi1> to vector<4x256xi1>
    %119 = vector.broadcast %cst_33 : f32 to vector<4x256xf32>
    %120 = arith.select %118, %106, %119 : vector<4x256xi1>, vector<4x256xf32>
    %121 = arith.addf %105, %120 : vector<4x256xf32>
    %c16_i32_34 = arith.constant 16 : i32
    %122 = vector.broadcast %c16_i32_34 : i32 to vector<1x256xi32>
    %123 = arith.cmpi sge, %3, %122 : vector<1x256xi32>
    %124 = arith.extui %123 : vector<1x256xi1> to vector<1x256xi32>
    %125 = arith.sitofp %124 : vector<1x256xi32> to vector<1x256xf32>
    %cst_35 = arith.constant 1.000000e+00 : f32
    %126 = vector.broadcast %cst_35 : f32 to vector<1x256xf32>
    %127 = arith.addf %126, %125 : vector<1x256xf32>
    %c240_i32_36 = arith.constant 240 : i32
    %128 = vector.broadcast %c240_i32_36 : i32 to vector<1x256xi32>
    %129 = arith.cmpi slt, %3, %128 : vector<1x256xi32>
    %130 = arith.extui %129 : vector<1x256xi1> to vector<1x256xi32>
    %131 = arith.sitofp %130 : vector<1x256xi32> to vector<1x256xf32>
    %132 = arith.addf %127, %131 : vector<1x256xf32>
    %c1_i32_37 = arith.constant 1 : i32
    %133 = vector.broadcast %c1_i32_37 : i32 to vector<1x256xi32>
    %134 = arith.cmpi sge, %5, %133 : vector<1x256xi32>
    %135 = arith.extui %134 : vector<1x256xi1> to vector<1x256xi32>
    %136 = arith.sitofp %135 : vector<1x256xi32> to vector<1x256xf32>
    %cst_38 = arith.constant 1.000000e+00 : f32
    %137 = vector.broadcast %cst_38 : f32 to vector<1x256xf32>
    %138 = arith.addf %137, %136 : vector<1x256xf32>
    %c14_i32_39 = arith.constant 14 : i32
    %139 = vector.broadcast %c14_i32_39 : i32 to vector<1x256xi32>
    %140 = arith.cmpi sle, %5, %139 : vector<1x256xi32>
    %141 = arith.extui %140 : vector<1x256xi1> to vector<1x256xi32>
    %142 = arith.sitofp %141 : vector<1x256xi32> to vector<1x256xf32>
    %143 = arith.addf %138, %142 : vector<1x256xf32>
    %144 = arith.mulf %132, %143 : vector<1x256xf32>
    %cst_40 = arith.constant 1.000000e+00 : f32
    %145 = vector.broadcast %cst_40 : f32 to vector<1x256xf32>
    %146 = arith.divf %145, %144 : vector<1x256xf32>
    %147 = vector.broadcast %146 : vector<1x256xf32> to vector<4x256xf32>
    %148 = arith.mulf %121, %147 : vector<4x256xf32>
    %c0_41 = arith.constant 0 : index
    %c0_42 = arith.constant 0 : index
    %149 = vector.load %arg2[%c0_41, %c0_42] : memref<4x9xf32, #tpu.memory_space<vmem>>, vector<4x9xf32>
    %150 = vector.extract_strided_slice %149 {offsets = [0, 4], sizes = [4, 1], strides = [1, 1]} : vector<4x9xf32> to vector<4x1xf32>
    %cst_43 = arith.constant 0.000000e+00 : f32
    %151 = vector.broadcast %cst_43 : f32 to vector<4x256xf32>
    %152 = arith.maximumf %1, %151 : vector<4x256xf32>
    %153 = vector.broadcast %150 : vector<4x1xf32> to vector<4x256xf32>
    %154 = arith.mulf %153, %152 : vector<4x256xf32>
    %c32_i32 = arith.constant 32 : i32
    %155 = vector.broadcast %c32_i32 : i32 to vector<1x256xi32>
    %156 = arith.cmpi sge, %3, %155 : vector<1x256xi32>
    %c2_i32 = arith.constant 2 : i32
    %157 = vector.broadcast %c2_i32 : i32 to vector<1x256xi32>
    %158 = arith.cmpi sge, %5, %157 : vector<1x256xi32>
    %159 = arith.andi %156, %158 : vector<1x256xi1>
    %c0_44 = arith.constant 0 : index
    %c14 = arith.constant 14 : index
    %160 = vector.load %arg6[%c0_44, %c14] : memref<4x352xf32, #tpu.memory_space<vmem>>, vector<4x256xf32>
    %cst_45 = arith.constant 0.000000e+00 : f32
    %161 = vector.broadcast %cst_45 : f32 to vector<4x256xf32>
    %162 = arith.maximumf %160, %161 : vector<4x256xf32>
    %cst_46 = arith.constant 0.000000e+00 : f32
    %163 = vector.shape_cast %159 : vector<1x256xi1> to vector<1x256xi1>
    %164 = vector.broadcast %163 : vector<1x256xi1> to vector<4x256xi1>
    %165 = vector.broadcast %cst_46 : f32 to vector<4x256xf32>
    %166 = arith.select %164, %162, %165 : vector<4x256xi1>, vector<4x256xf32>
    %167 = vector.extract_strided_slice %149 {offsets = [0, 0], sizes = [4, 1], strides = [1, 1]} : vector<4x9xf32> to vector<4x1xf32>
    %168 = vector.broadcast %167 : vector<4x1xf32> to vector<4x256xf32>
    %169 = arith.mulf %168, %166 : vector<4x256xf32>
    %170 = arith.addf %154, %169 : vector<4x256xf32>
    %c32_i32_47 = arith.constant 32 : i32
    %171 = vector.broadcast %c32_i32_47 : i32 to vector<1x256xi32>
    %172 = arith.cmpi sge, %3, %171 : vector<1x256xi32>
    %c0_48 = arith.constant 0 : index
    %c16 = arith.constant 16 : index
    %173 = vector.load %arg6[%c0_48, %c16] : memref<4x352xf32, #tpu.memory_space<vmem>>, vector<4x256xf32>
    %cst_49 = arith.constant 0.000000e+00 : f32
    %174 = vector.broadcast %cst_49 : f32 to vector<4x256xf32>
    %175 = arith.maximumf %173, %174 : vector<4x256xf32>
    %cst_50 = arith.constant 0.000000e+00 : f32
    %176 = vector.shape_cast %172 : vector<1x256xi1> to vector<1x256xi1>
    %177 = vector.broadcast %176 : vector<1x256xi1> to vector<4x256xi1>
    %178 = vector.broadcast %cst_50 : f32 to vector<4x256xf32>
    %179 = arith.select %177, %175, %178 : vector<4x256xi1>, vector<4x256xf32>
    %180 = vector.extract_strided_slice %149 {offsets = [0, 1], sizes = [4, 1], strides = [1, 1]} : vector<4x9xf32> to vector<4x1xf32>
    %181 = vector.broadcast %180 : vector<4x1xf32> to vector<4x256xf32>
    %182 = arith.mulf %181, %179 : vector<4x256xf32>
    %183 = arith.addf %170, %182 : vector<4x256xf32>
    %c32_i32_51 = arith.constant 32 : i32
    %184 = vector.broadcast %c32_i32_51 : i32 to vector<1x256xi32>
    %185 = arith.cmpi sge, %3, %184 : vector<1x256xi32>
    %c13_i32 = arith.constant 13 : i32
    %186 = vector.broadcast %c13_i32 : i32 to vector<1x256xi32>
    %187 = arith.cmpi sle, %5, %186 : vector<1x256xi32>
    %188 = arith.andi %185, %187 : vector<1x256xi1>
    %c0_52 = arith.constant 0 : index
    %c18 = arith.constant 18 : index
    %189 = vector.load %arg6[%c0_52, %c18] : memref<4x352xf32, #tpu.memory_space<vmem>>, vector<4x256xf32>
    %cst_53 = arith.constant 0.000000e+00 : f32
    %190 = vector.broadcast %cst_53 : f32 to vector<4x256xf32>
    %191 = arith.maximumf %189, %190 : vector<4x256xf32>
    %cst_54 = arith.constant 0.000000e+00 : f32
    %192 = vector.shape_cast %188 : vector<1x256xi1> to vector<1x256xi1>
    %193 = vector.broadcast %192 : vector<1x256xi1> to vector<4x256xi1>
    %194 = vector.broadcast %cst_54 : f32 to vector<4x256xf32>
    %195 = arith.select %193, %191, %194 : vector<4x256xi1>, vector<4x256xf32>
    %196 = vector.extract_strided_slice %149 {offsets = [0, 2], sizes = [4, 1], strides = [1, 1]} : vector<4x9xf32> to vector<4x1xf32>
    %197 = vector.broadcast %196 : vector<4x1xf32> to vector<4x256xf32>
    %198 = arith.mulf %197, %195 : vector<4x256xf32>
    %199 = arith.addf %183, %198 : vector<4x256xf32>
    %c2_i32_55 = arith.constant 2 : i32
    %200 = vector.broadcast %c2_i32_55 : i32 to vector<1x256xi32>
    %201 = arith.cmpi sge, %5, %200 : vector<1x256xi32>
    %c0_56 = arith.constant 0 : index
    %c46 = arith.constant 46 : index
    %202 = vector.load %arg6[%c0_56, %c46] : memref<4x352xf32, #tpu.memory_space<vmem>>, vector<4x256xf32>
    %cst_57 = arith.constant 0.000000e+00 : f32
    %203 = vector.broadcast %cst_57 : f32 to vector<4x256xf32>
    %204 = arith.maximumf %202, %203 : vector<4x256xf32>
    %cst_58 = arith.constant 0.000000e+00 : f32
    %205 = vector.shape_cast %201 : vector<1x256xi1> to vector<1x256xi1>
    %206 = vector.broadcast %205 : vector<1x256xi1> to vector<4x256xi1>
    %207 = vector.broadcast %cst_58 : f32 to vector<4x256xf32>
    %208 = arith.select %206, %204, %207 : vector<4x256xi1>, vector<4x256xf32>
    %209 = vector.extract_strided_slice %149 {offsets = [0, 3], sizes = [4, 1], strides = [1, 1]} : vector<4x9xf32> to vector<4x1xf32>
    %210 = vector.broadcast %209 : vector<4x1xf32> to vector<4x256xf32>
    %211 = arith.mulf %210, %208 : vector<4x256xf32>
    %212 = arith.addf %199, %211 : vector<4x256xf32>
    %c13_i32_59 = arith.constant 13 : i32
    %213 = vector.broadcast %c13_i32_59 : i32 to vector<1x256xi32>
    %214 = arith.cmpi sle, %5, %213 : vector<1x256xi32>
    %c0_60 = arith.constant 0 : index
    %c50 = arith.constant 50 : index
    %215 = vector.load %arg6[%c0_60, %c50] : memref<4x352xf32, #tpu.memory_space<vmem>>, vector<4x256xf32>
    %cst_61 = arith.constant 0.000000e+00 : f32
    %216 = vector.broadcast %cst_61 : f32 to vector<4x256xf32>
    %217 = arith.maximumf %215, %216 : vector<4x256xf32>
    %cst_62 = arith.constant 0.000000e+00 : f32
    %218 = vector.shape_cast %214 : vector<1x256xi1> to vector<1x256xi1>
    %219 = vector.broadcast %218 : vector<1x256xi1> to vector<4x256xi1>
    %220 = vector.broadcast %cst_62 : f32 to vector<4x256xf32>
    %221 = arith.select %219, %217, %220 : vector<4x256xi1>, vector<4x256xf32>
    %222 = vector.extract_strided_slice %149 {offsets = [0, 5], sizes = [4, 1], strides = [1, 1]} : vector<4x9xf32> to vector<4x1xf32>
    %223 = vector.broadcast %222 : vector<4x1xf32> to vector<4x256xf32>
    %224 = arith.mulf %223, %221 : vector<4x256xf32>
    %225 = arith.addf %212, %224 : vector<4x256xf32>
    %c224_i32 = arith.constant 224 : i32
    %226 = vector.broadcast %c224_i32 : i32 to vector<1x256xi32>
    %227 = arith.cmpi slt, %3, %226 : vector<1x256xi32>
    %c2_i32_63 = arith.constant 2 : i32
    %228 = vector.broadcast %c2_i32_63 : i32 to vector<1x256xi32>
    %229 = arith.cmpi sge, %5, %228 : vector<1x256xi32>
    %230 = arith.andi %227, %229 : vector<1x256xi1>
    %c0_64 = arith.constant 0 : index
    %c78 = arith.constant 78 : index
    %231 = vector.load %arg6[%c0_64, %c78] : memref<4x352xf32, #tpu.memory_space<vmem>>, vector<4x256xf32>
    %cst_65 = arith.constant 0.000000e+00 : f32
    %232 = vector.broadcast %cst_65 : f32 to vector<4x256xf32>
    %233 = arith.maximumf %231, %232 : vector<4x256xf32>
    %cst_66 = arith.constant 0.000000e+00 : f32
    %234 = vector.shape_cast %230 : vector<1x256xi1> to vector<1x256xi1>
    %235 = vector.broadcast %234 : vector<1x256xi1> to vector<4x256xi1>
    %236 = vector.broadcast %cst_66 : f32 to vector<4x256xf32>
    %237 = arith.select %235, %233, %236 : vector<4x256xi1>, vector<4x256xf32>
    %238 = vector.extract_strided_slice %149 {offsets = [0, 6], sizes = [4, 1], strides = [1, 1]} : vector<4x9xf32> to vector<4x1xf32>
    %239 = vector.broadcast %238 : vector<4x1xf32> to vector<4x256xf32>
    %240 = arith.mulf %239, %237 : vector<4x256xf32>
    %241 = arith.addf %225, %240 : vector<4x256xf32>
    %c224_i32_67 = arith.constant 224 : i32
    %242 = vector.broadcast %c224_i32_67 : i32 to vector<1x256xi32>
    %243 = arith.cmpi slt, %3, %242 : vector<1x256xi32>
    %c0_68 = arith.constant 0 : index
    %c80 = arith.constant 80 : index
    %244 = vector.load %arg6[%c0_68, %c80] : memref<4x352xf32, #tpu.memory_space<vmem>>, vector<4x256xf32>
    %cst_69 = arith.constant 0.000000e+00 : f32
    %245 = vector.broadcast %cst_69 : f32 to vector<4x256xf32>
    %246 = arith.maximumf %244, %245 : vector<4x256xf32>
    %cst_70 = arith.constant 0.000000e+00 : f32
    %247 = vector.shape_cast %243 : vector<1x256xi1> to vector<1x256xi1>
    %248 = vector.broadcast %247 : vector<1x256xi1> to vector<4x256xi1>
    %249 = vector.broadcast %cst_70 : f32 to vector<4x256xf32>
    %250 = arith.select %248, %246, %249 : vector<4x256xi1>, vector<4x256xf32>
    %251 = vector.extract_strided_slice %149 {offsets = [0, 7], sizes = [4, 1], strides = [1, 1]} : vector<4x9xf32> to vector<4x1xf32>
    %252 = vector.broadcast %251 : vector<4x1xf32> to vector<4x256xf32>
    %253 = arith.mulf %252, %250 : vector<4x256xf32>
    %254 = arith.addf %241, %253 : vector<4x256xf32>
    %c224_i32_71 = arith.constant 224 : i32
    %255 = vector.broadcast %c224_i32_71 : i32 to vector<1x256xi32>
    %256 = arith.cmpi slt, %3, %255 : vector<1x256xi32>
    %c13_i32_72 = arith.constant 13 : i32
    %257 = vector.broadcast %c13_i32_72 : i32 to vector<1x256xi32>
    %258 = arith.cmpi sle, %5, %257 : vector<1x256xi32>
    %259 = arith.andi %256, %258 : vector<1x256xi1>
    %c0_73 = arith.constant 0 : index
    %c82 = arith.constant 82 : index
    %260 = vector.load %arg6[%c0_73, %c82] : memref<4x352xf32, #tpu.memory_space<vmem>>, vector<4x256xf32>
    %cst_74 = arith.constant 0.000000e+00 : f32
    %261 = vector.broadcast %cst_74 : f32 to vector<4x256xf32>
    %262 = arith.maximumf %260, %261 : vector<4x256xf32>
    %cst_75 = arith.constant 0.000000e+00 : f32
    %263 = vector.shape_cast %259 : vector<1x256xi1> to vector<1x256xi1>
    %264 = vector.broadcast %263 : vector<1x256xi1> to vector<4x256xi1>
    %265 = vector.broadcast %cst_75 : f32 to vector<4x256xf32>
    %266 = arith.select %264, %262, %265 : vector<4x256xi1>, vector<4x256xf32>
    %267 = vector.extract_strided_slice %149 {offsets = [0, 8], sizes = [4, 1], strides = [1, 1]} : vector<4x9xf32> to vector<4x1xf32>
    %268 = vector.broadcast %267 : vector<4x1xf32> to vector<4x256xf32>
    %269 = arith.mulf %268, %266 : vector<4x256xf32>
    %270 = arith.addf %254, %269 : vector<4x256xf32>
    %c0_76 = arith.constant 0 : index
    %c0_77 = arith.constant 0 : index
    %271 = vector.load %arg3[%c0_76, %c0_77] : memref<4x4xf32, #tpu.memory_space<vmem>>, vector<4x4xf32>
    %272 = vector.extract_strided_slice %271 {offsets = [0, 0], sizes = [4, 1], strides = [1, 1]} : vector<4x4xf32> to vector<4x1xf32>
    %273 = vector.extract_strided_slice %270 {offsets = [0, 0], sizes = [1, 256], strides = [1, 1]} : vector<4x256xf32> to vector<1x256xf32>
    %274 = vector.broadcast %272 : vector<4x1xf32> to vector<4x256xf32>
    %275 = vector.broadcast %273 : vector<1x256xf32> to vector<4x256xf32>
    %276 = arith.mulf %274, %275 : vector<4x256xf32>
    %277 = vector.extract_strided_slice %271 {offsets = [0, 1], sizes = [4, 1], strides = [1, 1]} : vector<4x4xf32> to vector<4x1xf32>
    %278 = vector.extract_strided_slice %270 {offsets = [1, 0], sizes = [1, 256], strides = [1, 1]} : vector<4x256xf32> to vector<1x256xf32>
    %279 = vector.broadcast %277 : vector<4x1xf32> to vector<4x256xf32>
    %280 = vector.broadcast %278 : vector<1x256xf32> to vector<4x256xf32>
    %281 = arith.mulf %279, %280 : vector<4x256xf32>
    %282 = arith.addf %276, %281 : vector<4x256xf32>
    %283 = vector.extract_strided_slice %271 {offsets = [0, 2], sizes = [4, 1], strides = [1, 1]} : vector<4x4xf32> to vector<4x1xf32>
    %284 = vector.extract_strided_slice %270 {offsets = [2, 0], sizes = [1, 256], strides = [1, 1]} : vector<4x256xf32> to vector<1x256xf32>
    %285 = vector.broadcast %283 : vector<4x1xf32> to vector<4x256xf32>
    %286 = vector.broadcast %284 : vector<1x256xf32> to vector<4x256xf32>
    %287 = arith.mulf %285, %286 : vector<4x256xf32>
    %288 = arith.addf %282, %287 : vector<4x256xf32>
    %289 = vector.extract_strided_slice %271 {offsets = [0, 3], sizes = [4, 1], strides = [1, 1]} : vector<4x4xf32> to vector<4x1xf32>
    %290 = vector.extract_strided_slice %270 {offsets = [3, 0], sizes = [1, 256], strides = [1, 1]} : vector<4x256xf32> to vector<1x256xf32>
    %291 = vector.broadcast %289 : vector<4x1xf32> to vector<4x256xf32>
    %292 = vector.broadcast %290 : vector<1x256xf32> to vector<4x256xf32>
    %293 = arith.mulf %291, %292 : vector<4x256xf32>
    %294 = arith.addf %288, %293 : vector<4x256xf32>
    %c0_78 = arith.constant 0 : index
    %c0_79 = arith.constant 0 : index
    %295 = vector.load %arg4[%c0_78, %c0_79] : memref<4x5xf32, #tpu.memory_space<vmem>>, vector<4x5xf32>
    %296 = vector.extract_strided_slice %295 {offsets = [0, 3], sizes = [4, 1], strides = [1, 1]} : vector<4x5xf32> to vector<4x1xf32>
    %297 = vector.extract_strided_slice %295 {offsets = [0, 4], sizes = [4, 1], strides = [1, 1]} : vector<4x5xf32> to vector<4x1xf32>
    %298 = vector.broadcast %297 : vector<4x1xf32> to vector<4x256xf32>
    %299 = arith.mulf %298, %1 : vector<4x256xf32>
    %300 = vector.broadcast %296 : vector<4x1xf32> to vector<4x256xf32>
    %301 = arith.addf %300, %299 : vector<4x256xf32>
    %302 = vector.extract_strided_slice %295 {offsets = [0, 0], sizes = [4, 1], strides = [1, 1]} : vector<4x5xf32> to vector<4x1xf32>
    %303 = vector.broadcast %302 : vector<4x1xf32> to vector<4x256xf32>
    %304 = arith.mulf %303, %116 : vector<4x256xf32>
    %305 = arith.addf %301, %304 : vector<4x256xf32>
    %306 = vector.extract_strided_slice %295 {offsets = [0, 1], sizes = [4, 1], strides = [1, 1]} : vector<4x5xf32> to vector<4x1xf32>
    %307 = vector.broadcast %306 : vector<4x1xf32> to vector<4x256xf32>
    %308 = arith.mulf %307, %148 : vector<4x256xf32>
    %309 = arith.addf %305, %308 : vector<4x256xf32>
    %310 = vector.extract_strided_slice %295 {offsets = [0, 2], sizes = [4, 1], strides = [1, 1]} : vector<4x5xf32> to vector<4x1xf32>
    %311 = vector.broadcast %310 : vector<4x1xf32> to vector<4x256xf32>
    %312 = arith.mulf %311, %294 : vector<4x256xf32>
    %313 = arith.addf %309, %312 : vector<4x256xf32>
    %c0_80 = arith.constant 0 : index
    %c0_81 = arith.constant 0 : index
    %c0_82 = arith.constant 0 : index
    %314 = vector.load %arg5[%c0_80, %c0_81, %c0_82] : memref<1x4x256xf32, #tpu.memory_space<vmem>>, vector<1x4x256xf32>
    %315 = vector.shape_cast %314 : vector<1x4x256xf32> to vector<4x256xf32>
    %316 = vector.shape_cast %313 : vector<4x256xf32> to vector<1x4x256xf32>
    tpu.vector_store %arg5[%c0_80, %c0_81, %c0_82], %316 {strides = array<i32>} : memref<1x4x256xf32, #tpu.memory_space<vmem>>, vector<1x4x256xf32>,
    return
  }
  func.func @transform_0(%arg0: i32) -> (i32, i32, i32) {
    %c0_i32 = arith.constant 0 : i32
    %c0_i32_0 = arith.constant 0 : i32
    %c0_i32_1 = arith.constant 0 : i32
    return %arg0, %c0_i32, %c0_i32_0 : i32, i32, i32
  }
  func.func @transform_1(%arg0: i32) -> (i32, i32) {
    %c0_i32 = arith.constant 0 : i32
    %c0_i32_0 = arith.constant 0 : i32
    %c0_i32_1 = arith.constant 0 : i32
    return %c0_i32, %c0_i32_0 : i32, i32
  }
  func.func @transform_2(%arg0: i32) -> (i32, i32) {
    %c0_i32 = arith.constant 0 : i32
    %c0_i32_0 = arith.constant 0 : i32
    %c0_i32_1 = arith.constant 0 : i32
    return %c0_i32, %c0_i32_0 : i32, i32
  }
  func.func @transform_3(%arg0: i32) -> (i32, i32) {
    %c0_i32 = arith.constant 0 : i32
    %c0_i32_0 = arith.constant 0 : i32
    %c0_i32_1 = arith.constant 0 : i32
    return %c0_i32, %c0_i32_0 : i32, i32
  }
  func.func @transform_4(%arg0: i32) -> (i32, i32, i32) {
    %c0_i32 = arith.constant 0 : i32
    %c0_i32_0 = arith.constant 0 : i32
    %c0_i32_1 = arith.constant 0 : i32
    return %arg0, %c0_i32, %c0_i32_0 : i32, i32, i32
  }
}

</mosaic_0001>

<bundles_post_ra>
// kernel: mixed_op.3
= control target key start
LH: loop header
LB: loop body
LE: loop exit
PB: predicated region body
PF: predicated region fallthrough
CT: control target
= control target key end

     0   :  { %s1086_s15 = smov 0   ;;  %s1514_s0 = inlined_call_operand.vmem [shape: f32[2,4,256], index: 0, kind: input, shape index: {}]   ;;  %s1515_s1 = inlined_call_operand.vmem [shape: f32[4,9], index: 1, kind: input, shape index: {}]   ;;  %s1516_s2 = inlined_call_operand.vmem [shape: f32[4,4], index: 2, kind: input, shape index: {}]   ;;  %s1517_s3 = inlined_call_operand.vmem [shape: f32[4,5], index: 3, kind: input, shape index: {}]   ;;  %s1518_s4 = inlined_call_operand.vmem [shape: f32[2,4,256], index: 4, kind: output, shape index: {}]  }
   0x1 LB: > { %s951_s16 = sadd.s32 4294967295, %s1033_s15   ;;  %p955_p0 = scmp.ge.s32.totalorder %s1033_s15, 1  ;;  %s1033_s15 = sphi %s1086_s15, %s14_s15  }
   0x2   : > { %p162_p1 = scmp.lt.s32.totalorder %s1033_s15, 3 }
   0x4   : > { %p163_p2 = pnand %p955_p0, %p162_p1 }
   0x5   : > { %p188_p3 = scmp.lt.s32.totalorder (!%p163_p2), %s951_s16, 1  ;;  %v498_v0 = vld [vmem:[%s1515_s1] sm:$0xf] (!%p163_p2)  ;;  %v1035_v1 = vmov (!%p163_p2), 4   ;;  %v1036_v2 = vmov (!%p163_p2), 1   ;;  %v1037_v4 = vmov (!%p163_p2), 0   ;;  %v213_v56 = vlaneseq (!%p163_p2) }
   0x6   : > { %166 = sbr.rel (%p163_p2) target bundleno = 392 (0x188), region = 36  ;;  %1004 = vset.pattern.permute.xlu1 (!%p163_p2), %v1035_v1  ;;  %1013 = vset.pattern.permute.xlu0 (!%p163_p2), %v1036_v2  ;;  %s1038_s23 = smov (!%p163_p2), 48   ;;  %v1114_v5 = vld [vmem:[%s1516_s2] sm:$0xf] (!%p163_p2)  ;;  %v1039_v6 = vmov (!%p163_p2), 3   ;;  %v1040_v7 = vmov (!%p163_p2), 2  }
   0x7   : > { %502 = vperm.xlu1 (!%p163_p2), %1004, %v498_v0   ;;  %v1041_v8 = vmov (!%p163_p2), 5   ;;  %v1042_v9 = vmov (!%p163_p2), 6   ;;  %v1043_v10 = vmov (!%p163_p2), 7   ;;  %v1044_v11 = vmov (!%p163_p2), 8   ;;  %v1126_v12 = vld [vmem:[%s1517_s3] sm:$0xf] (!%p163_p2) }
   0x8   : > { %vm207_vm0 = vcmask (!%p163_p2), 1043840   ;;  %vm208_vm1 = vcmask (!%p163_p2), 1047556   ;;  %vm203_vm2 = vcmask (!%p163_p2), 392192   ;;  %vm211_vm3 = vcmask (!%p163_p2), 388096   ;;  %s1045_s28 = smov (!%p163_p2), 96   ;;  %s1046_s29 = smov (!%p163_p2), 97  }
   0x9   : > { %vm209_vm4 = vmor (!%p163_p2), %vm208_vm1, %vm207_vm0  ;;  %s1047_s30 = smov (!%p163_p2), 81   ;;  %s1048_s5 = smov (!%p163_p2), 95   ;;  %v1210_v59 = vand.u32 (!%p163_p2), 127, %v213_v56  ;;  %vm239_vm7 = vcmask (!%p163_p2), 793600   ;;  %vm268_vm10 = vcmask (!%p163_p2), 785408   ;;  %vm330_vm11 = vcmask (!%p163_p2), 662528  }
   0xa   : > { %s1049_s6 = smov (!%p163_p2), 65   ;;  %s1050_s7 = smov (!%p163_p2), 79   ;;  %vm392_vm13 = vcmask (!%p163_p2), 531456   ;;  %vm452_vm0 = vcmask (!%p163_p2), 515072  }
   0xb   : > { %1005 = vset.pattern.permute.xlu1 (!%p163_p2), %v1037_v4  ;;  %s1051_s8 = smov (!%p163_p2), 63   ;;  %s1052_s9 = smov (!%p163_p2), 64   ;;  %v1215_v62 = vadd.s32 (!%p163_p2), 128, %v1210_v59  ;;  %vm220_vm5 = vcmp.ge.s32.totalorder (!%p163_p2), %v1210_v59, 16 }
   0xc   : > { %541 = vperm.xlu1 (!%p163_p2), %1005, %v498_v0   ;;  %s1053_s10 = smov (!%p163_p2), 114   ;;  %s1054_s11 = smov (!%p163_p2), 112  }
   0xd   : > { %s1528_s16 = smov (!%p188_p3, %s951_s16), 1  ;;  %s1055_s12 = smov 110   ;;  %vm379_vm12 = vcmp.lt.s32.totalorder %v1215_v62, 240 }
   0xe   : > { %s968_s19 = sshll.u32 %s1528_s16, 3  ;;  %s1056_s13 = smov 82  }
   0xf   : > { %s192_s22 = scalar_lea.vmem %s1514_s0, %s968_s19  ;;  %s1057_s14 = smov 78  }
  0x10   : > { %v1106_v3 = vld [vmem:[%s192_s22] sm:$0xff]  ;;  %1006 = vset.pattern.permute.xlu1 %v1036_v2  ;;  %s1058_s17 = smov 50   ;;  %s1059_s18 = smov 46  }
  0x11   : > { %200 = vrot.lane.b32.xlu0 %v1106_v3, %s1038_s23  ;;  %573 = vperm.xlu1 %1006, %v498_v0   ;;  %s197_s22 = scalar_lea.vmem %s1518_s4, %s968_s19 }
  0x15   : > { %798 = vperm.xlu0 %1013, %v1114_v5   ;;  %1007 = vset.pattern.permute.xlu1 %v1040_v7 }
  0x16   : > { %609 = vperm.xlu1 %1007, %v498_v0  }
  0x19   : > { %1014 = vset.pattern.permute.xlu0 %v1039_v6 }
  0x1a   : > { %641 = vperm.xlu0 %1014, %v498_v0   ;;  %1008 = vset.pattern.permute.xlu1 %v1041_v8 }
  0x1b   : > { %673 = vperm.xlu1 %1008, %v498_v0  }
  0x1f   : > { %1009 = vset.pattern.permute.xlu1 %v1042_v9 }
  0x20   : > { %709 = vperm.xlu1 %1009, %v498_v0  }
  0x24   : > { %1010 = vset.pattern.permute.xlu1 %v1043_v10 }
  0x25   : > { %740 = vperm.xlu1 %1010, %v498_v0  }
  0x29   : > { %1011 = vset.pattern.permute.xlu1 %v1044_v11 }
  0x2a   : > { %774 = vperm.xlu1 %1011, %v498_v0  }
  0x2e   : > { %1012 = vset.pattern.permute.xlu1 %v1037_v4 }
  0x2f   : > { %784 = vperm.xlu1 %1012, %v1114_v5  }
  0x33   : > { %1015 = vset.pattern.permute.xlu1 %v1040_v7 }
  0x34   : > { %814 = vperm.xlu1 %1015, %v1114_v5  }
  0x38   : > { %1016 = vset.pattern.permute.xlu1 %v1035_v1  ;;  %v1220_v1 = vand.u32 15, %v1210_v59 }
  0x39   : > { %848 = vperm.xlu1 %1016, %v1126_v12  }
  0x3a   : > { %vm222_vm6 = vcmp.ge.s32.totalorder %v1220_v1, 1  ;;  %vm287_vm1 = vcmp.le.s32.totalorder %v1220_v1, 14 }
  0x3b   : > { %vm224_vm9 = vmand %vm220_vm5, %vm222_vm6 }
  0x3d   : > { %1017 = vset.pattern.permute.xlu1 %v1039_v6 }
  0x83   : > { %v201_v13 = vpop.permute.xlu0 %200 }
  0x84   : > { %v202_v14 = vrot.slane %v201_v13, 4 }
  0x86   : > { %v204_v15 = vsel %vm203_vm2, %v202_v14, %v201_v13  ;;  %212 = vst.msk [vmem:[#allocation2 + $0x8] sm:$0xf] %vm211_vm3, %v202_v14  ;;  %v1147_v29 = vpop.permute.xlu1 %502 }
  0x87   : > { %210 = vst.msk [vmem:[#allocation2] sm:$0xff] %vm209_vm4, %v204_v15  ;;  %vm301_vm4 = vcmask 777216  }
  0x8b   : > { %v1151_v34 = vpop.permute.xlu1 %541 }
  0x8d   : > { %v219_v16 = vld [vmem:[#allocation2 + $0x8] sm:$0xf] }
  0x8e   : > { %266 = vrot.lane.b32.xlu0 %v219_v16, %s1045_s28  ;;  %237 = vrot.lane.b32.xlu1 %v219_v16, %s1046_s29  ;;  %v218_v17 = vld [vmem:[#allocation2] sm:$0xff]  ;;  %v517_v19 = vld [vmem:[#allocation2 + $0x8] sm:$0xf] }
  0x8f   : > { %v232_v18 = vcombine.high %v218_v17, %v218_v17  ;;  %v519_v20 = vmax.f32 %v517_v19, 0.0  ;;  %v549_v21 = vld [vmem:[#allocation2 + $0x8] sm:$0xf]  ;;  %v718_v27 = vmax.f32 %v218_v17, 0.0 }
  0x90   : > { %v551_v22 = vmax.f32 %v549_v21, 0.0  ;;  %v585_v23 = vld [vmem:[#allocation2 + $0x8] sm:$0xf]  ;;  %v1157_v38 = vpop.permute.xlu1 %573 }
  0x91   : > { %v587_v24 = vmax.f32 %v585_v23, 0.0  ;;  %v617_v25 = vld [vmem:[#allocation2 + $0x8] sm:$0xf]  ;;  %v526_v31 = vcombine.high %v718_v27, %v718_v27 }
  0x92   : > { %328 = vrot.lane.b32.xlu0 %v219_v16, %s1047_s30  ;;  %299 = vrot.lane.b32.xlu1 %v219_v16, %s1048_s5  ;;  %v619_v26 = vmax.f32 %v617_v25, 0.0  ;;  %v649_v28 = vld [vmem:[#allocation2 + $0x8] sm:$0xf] }
  0x93   : > { %v651_v30 = vmax.f32 %v649_v28, 0.0  ;;  %v685_v32 = vld [vmem:[#allocation2 + $0x8] sm:$0xf] }
  0x94   : > { %v687_v33 = vmax.f32 %v685_v32, 0.0  ;;  %v717_v35 = vld [vmem:[#allocation2 + $0x8] sm:$0xf]  ;;  %v1191_v47 = vpop.permute.xlu0 %798 }
  0x95   : > { %v719_v36 = vmax.f32 %v717_v35, 0.0  ;;  %v750_v37 = vld [vmem:[#allocation2 + $0x8] sm:$0xf]  ;;  %v1160_v40 = vpop.permute.xlu1 %609 }
  0x96   : > { %390 = vrot.lane.b32.xlu0 %v219_v16, %s1049_s6  ;;  %357 = vrot.lane.b32.xlu1 %v219_v16, %s1050_s7  ;;  %v752_v39 = vmax.f32 %v750_v37, 0.0 }
  0x99   : > { %v1196_v49 = vpop.permute.xlu0 %641 }
  0x9a   : > { %450 = vrot.lane.b32.xlu0 %v219_v16, %s1051_s8  ;;  %419 = vrot.lane.b32.xlu1 %v219_v16, %s1052_s9  ;;  %v1166_v41 = vpop.permute.xlu1 %673 }
  0x9e   : > { %295 = vrot.lane.b32.xlu1 %v218_v17, %s1048_s5  ;;  %233 = vrot.lane.b32.xlu0 %v218_v17, %s1046_s29 }
  0x9f   : > { %v1170_v42 = vpop.permute.xlu1 %709 }
  0xa2   : > { %353 = vrot.lane.b32.xlu1 %v218_v17, %s1050_s7  ;;  %262 = vrot.lane.b32.xlu0 %v218_v17, %s1045_s28 }
  0xa4   : > { %v1175_v43 = vpop.permute.xlu1 %740 }
  0xa6   : > { %415 = vrot.lane.b32.xlu1 %v218_v17, %s1052_s9  ;;  %324 = vrot.lane.b32.xlu0 %v218_v17, %s1047_s30 }
  0xa9   : > { %v1180_v44 = vpop.permute.xlu1 %774 }
  0xaa   : > { %386 = vrot.lane.b32.xlu0 %v218_v17, %s1049_s6  ;;  %235 = vrot.lane.b32.xlu1 %v232_v18, %s1046_s29 }
  0xae   : > { %446 = vrot.lane.b32.xlu0 %v218_v17, %s1051_s8  ;;  %264 = vrot.lane.b32.xlu1 %v232_v18, %s1045_s28  ;;  %v1186_v45 = vpop.permute.xlu1 %784 }
  0xb2   : > { %531 = vrot.lane.b32.xlu0 %v519_v20, %s1053_s10  ;;  %326 = vrot.lane.b32.xlu1 %v232_v18, %s1047_s30 }
  0xb3   : > { %v1189_v46 = vpop.permute.xlu1 %814 }
  0xb6   : > { %563 = vrot.lane.b32.xlu0 %v551_v22, %s1054_s11  ;;  %388 = vrot.lane.b32.xlu1 %v232_v18, %s1049_s6 }
  0xb8   : > { %v1194_v48 = vpop.permute.xlu1 %848 }
  0xba   : > { %599 = vrot.lane.b32.xlu0 %v587_v24, %s1055_s12  ;;  %448 = vrot.lane.b32.xlu1 %v232_v18, %s1051_s8 }
  0xbe   : > { %631 = vrot.lane.b32.xlu0 %v619_v26, %s1056_s13  ;;  %727 = vrot.lane.b32.xlu1 %v718_v27, %s1038_s23 }
  0xc2   : > { %663 = vrot.lane.b32.xlu0 %v651_v30, %s1057_s14  ;;  %529 = vrot.lane.b32.xlu1 %v526_v31, %s1053_s10 }
  0xc6   : > { %699 = vrot.lane.b32.xlu0 %v687_v33, %s1058_s17  ;;  %561 = vrot.lane.b32.xlu1 %v526_v31, %s1054_s11 }
  0xca   : > { %731 = vrot.lane.b32.xlu0 %v719_v36, %s1038_s23  ;;  %597 = vrot.lane.b32.xlu1 %v526_v31, %s1055_s12 }
  0xce   : > { %764 = vrot.lane.b32.xlu0 %v752_v39, %s1059_s18  ;;  %629 = vrot.lane.b32.xlu1 %v526_v31, %s1056_s13 }
  0xd2   : > { %297 = vrot.lane.b32.xlu0 %v232_v18, %s1048_s5  ;;  %661 = vrot.lane.b32.xlu1 %v526_v31, %s1057_s14 }
  0xd6   : > { %355 = vrot.lane.b32.xlu0 %v232_v18, %s1050_s7  ;;  %697 = vrot.lane.b32.xlu1 %v526_v31, %s1058_s17 }
  0xda   : > { %417 = vrot.lane.b32.xlu0 %v232_v18, %s1052_s9  ;;  %729 = vrot.lane.b32.xlu1 %v526_v31, %s1038_s23 }
  0xde   : > { %527 = vrot.lane.b32.xlu0 %v718_v27, %s1053_s10  ;;  %762 = vrot.lane.b32.xlu1 %v526_v31, %s1059_s18 }
  0xe2   : > { %559 = vrot.lane.b32.xlu0 %v718_v27, %s1054_s11  ;;  %856 = vperm.xlu1 %1017, %v1126_v12  }
  0xe6   : > { %595 = vrot.lane.b32.xlu0 %v718_v27, %s1055_s12  ;;  %1018 = vset.pattern.permute.xlu1 %v1037_v4 }
  0xe7   : > { %862 = vperm.xlu1 %1018, %v1126_v12  }
  0xea   : > { %627 = vrot.lane.b32.xlu0 %v718_v27, %s1056_s13 }
  0xeb   : > { %1020 = vset.pattern.permute.xlu1 %v1040_v7 }
  0xec   : > { %884 = vperm.xlu1 %1020, %v1126_v12  }
  0xee   : > { %659 = vrot.lane.b32.xlu0 %v718_v27, %s1057_s14 }
  0xf2   : > { %695 = vrot.lane.b32.xlu0 %v718_v27, %s1058_s17 }
  0xf6   : > { %760 = vrot.lane.b32.xlu0 %v718_v27, %s1059_s18 }
  0xfa   : > { %830 = vperm.xlu0 %1014, %v1114_v5  }
  0xfe   : > { %1019 = vset.pattern.permute.xlu0 %v1036_v2  ;;  %v1223_v2 = vand.u32 15, %v1215_v62 }
  0xff   : > { %873 = vperm.xlu0 %1019, %v1126_v12  }
 0x100   : > { %v238_v50 = vpop.permute.xlu1 %237  ;;  %v267_v51 = vpop.permute.xlu0 %266  ;;  %vm223_vm8 = vcmp.ge.s32.totalorder %v1223_v2, 1  ;;  %vm288_vm15 = vcmp.le.s32.totalorder %v1223_v2, 14 }
 0x101   : > { %vm381_vm14 = vmand %vm379_vm12, %vm223_vm8 }
 0x102   : > { %vm441_vm3 = vmand %vm379_vm12, %vm288_vm15 }
 0x103   : > { %1021 = vset.pattern.permute.xlu0 %v1040_v7 }
 0x104   : > { %v1201_v52 = vpop.permute.xlu1 %299  ;;  %v329_v53 = vpop.permute.xlu0 %328 }
 0x108   : > { %v1203_v54 = vpop.permute.xlu1 %357  ;;  %v391_v55 = vpop.permute.xlu0 %390 }
 0x10c   : > { %v1205_v57 = vpop.permute.xlu1 %419  ;;  %v1207_v58 = vpop.permute.xlu0 %450 }
 0x110   : > { %v1212_v60 = vpop.permute.xlu1 %295  ;;  %v234_v61 = vpop.permute.xlu0 %233 }
 0x114   : > { %v1217_v63 = vpop.permute.xlu1 %353  ;;  %v263_v0 = vpop.permute.xlu0 %262 }
 0x118   : > { %v1225_v4 = vpop.permute.xlu1 %415  ;;  %v325_v5 = vpop.permute.xlu0 %324 }
 0x11c   : > { %v236_v6 = vpop.permute.xlu1 %235  ;;  %v387_v7 = vpop.permute.xlu0 %386 }
 0x11d   : > { %v240_v8 = vsel %vm239_vm7, %v234_v61, %v236_v6  ;;  %v241_v9 = vsel %vm239_vm7, %v236_v6, %v238_v50  ;;  %vm289_vm7 = vmand %vm220_vm5, %vm287_vm1 }
 0x11e   : > { %v244_v10 = vsel %vm224_vm9, %v240_v8, -inf  ;;  %v245_v11 = vsel %vm223_vm8, %v241_v9, -inf  ;;  %v251_v12 = vsel %vm224_vm9, %v240_v8, 0.0  ;;  %v252_v13 = vsel %vm223_vm8, %v241_v9, 0.0 }
 0x11f   : > { %v248_v14 = vcombine.low %v244_v10, %v245_v11  ;;  %v255_v15 = vcombine.low %v251_v12, %v252_v13  ;;  %vm359_vm9 = vcmask 646144  }
 0x120   : > { %v265_v16 = vpop.permute.xlu1 %264  ;;  %v447_v17 = vpop.permute.xlu0 %446 }
 0x121   : > { %v269_v18 = vsel %vm268_vm10, %v263_v0, %v265_v16  ;;  %v270_v19 = vsel %vm268_vm10, %v265_v16, %v267_v51  ;;  %v250_v22 = vmax.f32 %v1106_v3, %v248_v14  ;;  %v257_v23 = vadd.f32 %v255_v15, %v1106_v3 }
 0x122   : > { %v273_v20 = vsel %vm220_vm5, %v269_v18, -inf  ;;  %v280_v21 = vsel %vm220_vm5, %v269_v18, 0.0  ;;  %vm421_vm10 = vcmask 523264  }
 0x123   : > { %v277_v24 = vcombine.low %v273_v20, %v270_v19  ;;  %v284_v25 = vcombine.low %v280_v21, %v270_v19 }
 0x124   : > { %v327_v26 = vpop.permute.xlu1 %326  ;;  %v1244_v27 = vpop.permute.xlu0 %531 }
 0x125   : > { %v1247_v28 = vmax.f32 %v250_v22, %v277_v24  ;;  %v286_v30 = vadd.f32 %v284_v25, %v257_v23  ;;  %v331_v31 = vsel %vm330_vm11, %v325_v5, %v327_v26  ;;  %v332_v32 = vsel %vm330_vm11, %v327_v26, %v329_v53 }
 0x126   : > { %v335_v33 = vsel %vm222_vm6, %v331_v31, -inf  ;;  %v336_v35 = vsel %vm223_vm8, %v332_v32, -inf  ;;  %v1255_v36 = vsel %vm222_vm6, %v331_v31, 0.0  ;;  %v1259_v37 = vsel %vm223_vm8, %v332_v32, 0.0 }
 0x127   : > { %v339_v39 = vcombine.low %v335_v33, %v336_v35  ;;  %v346_v50 = vcombine.low %v1255_v36, %v1259_v37  ;;  %vm533_vm11 = vcmask 932864  }
 0x128   : > { %v389_v51 = vpop.permute.xlu1 %388  ;;  %v1267_v53 = vpop.permute.xlu0 %563 }
 0x129   : > { %v393_v61 = vsel %vm392_vm13, %v387_v7, %v389_v51  ;;  %v394_v0 = vsel %vm392_vm13, %v389_v51, %v391_v55  ;;  %vm513_vm13 = vcmp.ge.s32.totalorder %v1223_v2, 2 }
 0x12a   : > { %v397_v5 = vsel %vm222_vm6, %v393_v61, -inf  ;;  %v398_v6 = vsel %vm381_vm14, %v394_v0, -inf  ;;  %v404_v8 = vsel %vm222_vm6, %v393_v61, 0.0  ;;  %v405_v9 = vsel %vm381_vm14, %v394_v0, 0.0 }
 0x12b   : > { %v1276_v10 = vcombine.low %v397_v5, %v398_v6  ;;  %v1278_v11 = vcombine.low %v404_v8, %v405_v9  ;;  %vm512_vm14 = vcmp.ge.s32.totalorder %v1220_v1, 2 }
 0x12c   : > { %v449_v55 = vpop.permute.xlu1 %448  ;;  %v1285_v7 = vpop.permute.xlu0 %599 }
 0x12d   : > { %v453_v12 = vsel %vm452_vm0, %v447_v17, %v449_v55  ;;  %v454_v13 = vsel %vm452_vm0, %v449_v55, %v1207_v58  ;;  %vm601_vm0 = vcmask 900096  }
 0x12e   : > { %v457_v14 = vsel %vm287_vm1, %v453_v12, -inf  ;;  %v458_v15 = vsel %vm441_vm3, %v454_v13, -inf  ;;  %v464_v16 = vsel %vm287_vm1, %v453_v12, 0.0  ;;  %v465_v18 = vsel %vm441_vm3, %v454_v13, 0.0 }
 0x12f   : > { %v1292_v19 = vcombine.low %v457_v14, %v458_v15  ;;  %v1294_v20 = vcombine.low %v464_v16, %v465_v18  ;;  %vm565_vm3 = vcmask 916480  }
 0x130   : > { %v1296_v21 = vpop.permute.xlu1 %727  ;;  %v1298_v22 = vpop.permute.xlu0 %631 }
 0x134   : > { %v1300_v23 = vpop.permute.xlu1 %529  ;;  %v1302_v17 = vpop.permute.xlu0 %663 }
 0x138   : > { %v1304_v58 = vpop.permute.xlu0 %699  ;;  %v1306_v24 = vpop.permute.xlu1 %561 }
 0x13c   : > { %v1308_v25 = vpop.permute.xlu0 %731  ;;  %v1310_v26 = vpop.permute.xlu1 %597 }
 0x140   : > { %v1312_v31 = vpop.permute.xlu0 %764  ;;  %v1320_v36 = vpop.permute.xlu1 %629 }
 0x144   : > { %v298_v32 = vpop.permute.xlu0 %297  ;;  %v1336_v18 = vpop.permute.xlu1 %661 }
 0x145   : > { %v302_v33 = vsel %vm301_vm4, %v1212_v60, %v298_v32  ;;  %v303_v35 = vsel %vm301_vm4, %v298_v32, %v1201_v52  ;;  %v499_v52 = vmax.f32 %v1106_v3, 0.0  ;;  %vm581_vm4 = vcmp.le.s32.totalorder %v1223_v2, 13 }
 0x146   : > { %v306_v37 = vsel %vm289_vm7, %v302_v33, -inf  ;;  %v307_v51 = vsel %vm288_vm15, %v303_v35, -inf  ;;  %v313_v61 = vsel %vm289_vm7, %v302_v33, 0.0  ;;  %v314_v5 = vsel %vm288_vm15, %v303_v35, 0.0 }
 0x147   : > { %v310_v0 = vcombine.low %v306_v37, %v307_v51  ;;  %v317_v6 = vcombine.low %v313_v61, %v314_v5  ;;  %v506_v33 = vcombine.high %v499_v52, %v499_v52  ;;  %v1060_v37 = vmov 0.0  }
 0x148   : > { %v356_v8 = vpop.permute.xlu0 %355  ;;  %v960_v51 = vsel %vm220_vm5, 1.0, %v1060_v37  ;;  %vm510_vm5 = vcmp.ge.s32.totalorder %v1210_v59, 32 }
 0x149   : > { %v312_v9 = vmax.f32 %v1247_v28, %v310_v0  ;;  %v360_v60 = vsel %vm359_vm9, %v1217_v63, %v356_v8  ;;  %v319_v55 = vadd.f32 %v317_v6, %v286_v30  ;;  %v361_v12 = vsel %vm359_vm9, %v356_v8, %v1203_v54  ;;  %vm1373_vm7 = vmand %vm510_vm5, %vm512_vm14 }
 0x14a   : > { %v364_v13 = vsel %vm287_vm1, %v360_v60, -inf  ;;  %v365_v15 = vsel %vm288_vm15, %v361_v12, -inf  ;;  %v371_v16 = vsel %vm287_vm1, %v360_v60, 0.0  ;;  %v372_v30 = vsel %vm288_vm15, %v361_v12, 0.0 }
 0x14b   : > { %v341_v14 = vmax.f32 %v312_v9, %v339_v39  ;;  %v348_v28 = vadd.f32 %v346_v50, %v319_v55  ;;  %v368_v63 = vcombine.low %v364_v13, %v365_v15  ;;  %v375_v54 = vcombine.low %v371_v16, %v372_v30 }
 0x14c   : > { %v418_v32 = vpop.permute.xlu0 %417  ;;  %v535_v0 = vsel %vm533_vm11, %v1300_v23, %v1244_v27  ;;  %v1354_v9 = vmul.f32 %v1147_v29, %v499_v52  ;;  %v509_v12 = vmul.f32 %v506_v33, %v1147_v29  ;;  %v473_v13 = vadd.f32 1.0, %v960_v51  ;;  %v1358_v27 = vpop.permute.xlu1 %697 }
 0x14d   : > { %v370_v35 = vmax.f32 %v341_v14, %v368_v63  ;;  %v422_v39 = vsel %vm421_vm10, %v1225_v4, %v418_v32  ;;  %v377_v61 = vadd.f32 %v375_v54, %v348_v28  ;;  %v423_v50 = vsel %vm421_vm10, %v418_v32, %v1205_v57 }
 0x14e   : > { %v427_v6 = vsel %vm379_vm12, %v423_v50, -inf  ;;  %v434_v4 = vsel %vm379_vm12, %v423_v50, 0.0  ;;  %v962_v15 = vsel %vm222_vm6, 1.0, %v1060_v37  ;;  %v963_v32 = vsel %vm223_vm8, 1.0, %v1060_v37 }
 0x14f   : > { %v403_v5 = vmax.f32 %v370_v35, %v1276_v10  ;;  %v410_v60 = vadd.f32 %v1278_v11, %v377_v61  ;;  %v430_v55 = vcombine.low %v422_v39, %v427_v6  ;;  %v437_v57 = vcombine.low %v422_v39, %v434_v4 }
 0x150   : > { %v528_v8 = vpop.permute.xlu0 %527  ;;  %v539_v10 = vsel %vm513_vm13, %v535_v0, 0.0  ;;  %v961_v11 = vsel %vm379_vm12, 1.0, %v1060_v37  ;;  %v603_v33 = vsel %vm601_vm0, %v1310_v26, %v1285_v7  ;;  %vm633_vm6 = vcmask 670720   ;;  %v730_v35 = vpop.permute.xlu1 %729 }
 0x151   : > { %v432_v14 = vmax.f32 %v403_v5, %v430_v55  ;;  %v439_v52 = vadd.f32 %v437_v57, %v410_v60  ;;  %v534_v28 = vsel %vm533_vm11, %v528_v8, %v1300_v23  ;;  %v545_v54 = vmul.f32 %v1151_v34, %v539_v10 }
 0x152   : > { %vm580_vm12 = vcmp.le.s32.totalorder %v1220_v1, 13  ;;  %v567_v23 = vsel %vm565_vm3, %v1306_v24, %v1267_v53  ;;  %vm665_vm9 = vcmask 637952   ;;  %vm681_vm10 = vcmp.lt.s32.totalorder %v1215_v62, 224 }
 0x153   : > { %v1380_v63 = vmax.f32 %v432_v14, %v1292_v19  ;;  %v1383_v30 = vadd.f32 %v1294_v20, %v439_v52  ;;  %v481_v20 = vadd.f32 1.0, %v962_v15  ;;  %v538_v39 = vsel %vm1373_vm7, %v534_v28, 0.0  ;;  %vm1409_vm11 = vmand %vm510_vm5, %vm580_vm12 }
 0x154   : > { %v560_v29 = vpop.permute.xlu0 %559  ;;  %v482_v61 = vadd.f32 1.0, %v963_v32  ;;  %v964_v7 = vsel %vm287_vm1, 1.0, %v1060_v37  ;;  %v607_v50 = vsel %vm581_vm4, %v603_v33, 0.0  ;;  %v635_v53 = vsel %vm633_vm6, %v1320_v36, %v1298_v22  ;;  %vm1435_vm1 = vmand %vm681_vm10, %vm513_vm13 }
 0x155   : > { %v566_v19 = vsel %vm565_vm3, %v560_v29, %v1306_v24  ;;  %vm701_vm8 = vcmask 408576   ;;  %v547_v5 = vadd.f32 %v545_v54, %v509_v12  ;;  %v577_v6 = vmul.f32 %v1157_v38, %v567_v23  ;;  %v763_v29 = vpop.permute.xlu1 %762 }
 0x156   : > { %v667_v4 = vsel %vm665_vm9, %v1336_v18, %v1302_v17  ;;  %v570_v22 = vsel %vm510_vm5, %v566_v19, 0.0  ;;  %v477_v8 = vadd.f32 1.0, %v473_v13  ;;  %v478_v60 = vadd.f32 2.0, %v961_v11 }
 0x157   : > { %v544_v55 = vmul.f32 %v1151_v34, %v538_v39  ;;  %v965_v57 = vsel %vm288_vm15, 1.0, %v1060_v37  ;;  %v613_v10 = vmul.f32 %v1160_v40, %v607_v50  ;;  %v485_v17 = vadd.f32 %v964_v7, %v481_v20 }
 0x158   : > { %v596_v51 = vpop.permute.xlu0 %595  ;;  %v671_v59 = vsel %vm581_vm4, %v667_v4, 0.0  ;;  %v703_v37 = vsel %vm701_vm8, %v1358_v27, %v1304_v58  ;;  %v576_v13 = vmul.f32 %v1157_v38, %v570_v22  ;;  %v579_v11 = vadd.f32 %v577_v6, %v547_v5 }
 0x159   : > { %v602_v0 = vsel %vm601_vm0, %v596_v51, %v1310_v26  ;;  %v639_v26 = vsel %vm513_vm13, %v635_v53, 0.0  ;;  %vm766_vm15 = vcmask 375808   ;;  %v486_v16 = vadd.f32 %v965_v57, %v482_v61  ;;  %vm1459_vm13 = vmand %vm681_vm10, %vm581_vm4 }
 0x15a   : > { %v606_v12 = vsel %vm1409_vm11, %v602_v0, 0.0  ;;  %v645_v28 = vmul.f32 %v1196_v49, %v639_v26  ;;  %v734_v32 = vsel %vm203_vm2, %v730_v35, %v1308_v25  ;;  %v546_v54 = vadd.f32 %v544_v55, %v1354_v9 }
 0x15b   : > { %v612_v58 = vmul.f32 %v1160_v40, %v606_v12  ;;  %v615_v38 = vadd.f32 %v613_v10, %v579_v11  ;;  %v677_v33 = vmul.f32 %v1166_v41, %v671_v59  ;;  %v487_v19 = vmul.f32 %v485_v17, %v477_v8 }
 0x15c   : > { %v628_v14 = vpop.permute.xlu0 %627  ;;  %v768_v25 = vsel %vm766_vm15, %v763_v29, %v1312_v31  ;;  %v578_v40 = vadd.f32 %v576_v13, %v546_v54  ;;  %v738_v51 = vsel %vm681_vm10, %v734_v32, 0.0  ;;  %v488_v61 = vmul.f32 %v486_v16, %v478_v60 }
 0x15d   : > { %v634_v52 = vsel %vm633_vm6, %v628_v14, %v1320_v36  ;;  %v707_v36 = vsel %vm1435_vm1, %v703_v37, 0.0  ;;  %v647_v7 = vadd.f32 %v645_v28, %v615_v38  ;;  %v772_v31 = vsel %vm1459_vm13, %v768_v25, 0.0 }
 0x15e   : > { %v638_v15 = vsel %vm512_vm14, %v634_v52, 0.0  ;;  %v713_v50 = vmul.f32 %v1170_v42, %v707_v36  ;;  %v614_v53 = vadd.f32 %v612_v58, %v578_v40  ;;  %1023 = vrcp.f32 %v487_v19 }
 0x15f   : > { %v644_v9 = vmul.f32 %v1196_v49, %v638_v15  ;;  %v679_v0 = vadd.f32 %v677_v33, %v647_v7  ;;  %v733_v6 = vsel %vm203_vm2, %v1296_v21, %v730_v35  ;;  %1025 = vrcp.f32 %v488_v61 }
 0x160   : > { %v660_v23 = vpop.permute.xlu0 %659  ;;  %v778_v8 = vmul.f32 %v1180_v44, %v772_v31  ;;  %v743_v10 = vmul.f32 %v1175_v43, %v733_v6  ;;  %v851_v33 = vcombine.high %v1106_v3, %v1106_v3 }
 0x161   : > { %v666_v39 = vsel %vm665_vm9, %v660_v23, %v1336_v18  ;;  %v744_v18 = vmul.f32 %v1175_v43, %v738_v51  ;;  %v646_v62 = vadd.f32 %v644_v9, %v614_v53  ;;  %v715_v22 = vadd.f32 %v713_v50, %v679_v0  ;;  %v857_v16 = vpop.permute.xlu1 %856 }
 0x162   : > { %v670_v2 = vsel %vm580_vm12, %v666_v39, 0.0  ;;  %v853_v51 = vmul.f32 %v1194_v48, %v1106_v3 }
 0x163   : > { %v676_v24 = vmul.f32 %v1166_v41, %v670_v2  ;;  %v788_v41 = vshrl.u32 %v213_v56, 7  ;;  %v746_v26 = vadd.f32 %v744_v18, %v715_v22  ;;  %v854_v2 = vmul.f32 %v851_v33, %v1194_v48 }
 0x164   : > { %v696_v49 = vpop.permute.xlu0 %695 }
 0x165   : > { %v702_v5 = vsel %vm701_vm8, %v696_v49, %v1358_v27  ;;  %v678_v60 = vadd.f32 %v676_v24, %v646_v62  ;;  %v789_v35 = vsub.s32 0, %v788_v41  ;;  %v780_v14 = vadd.f32 %v778_v8, %v746_v26 }
 0x166   : > { %v706_v4 = vsel %vm512_vm14, %v702_v5, 0.0  ;;  %v803_v59 = vsub.s32 1, %v788_v41  ;;  %v819_v15 = vsub.s32 2, %v788_v41  ;;  %v835_v54 = vsub.s32 3, %v788_v41  ;;  %v863_v19 = vpop.permute.xlu1 %862 }
 0x167   : > { %v712_v55 = vmul.f32 %v1170_v42, %v706_v4  ;;  %v794_v42 = vrot.slane %v780_v14, %v789_v35  ;;  %v868_v50 = vmul.f32 %v863_v19, %v1380_v63  ;;  %v859_v49 = vadd.f32 %v857_v16, %v853_v51 }
 0x168   : > { %v761_v57 = vpop.permute.xlu0 %760  ;;  %v1024_v37 = vpop.eup %1023  ;;  %v808_v11 = vrot.slane %v780_v14, %v803_v59  ;;  %v824_v38 = vrot.slane %v780_v14, %v819_v15  ;;  %v840_v25 = vrot.slane %v780_v14, %v835_v54  ;;  %v860_v0 = vadd.f32 %v857_v16, %v854_v2 }
 0x169   : > { %v714_v27 = vadd.f32 %v712_v55, %v678_v60  ;;  %v767_v12 = vsel %vm766_vm15, %v761_v57, %v763_v29  ;;  %v1026_v43 = vpop.eup %1025  ;;  %v796_v1 = vmul.f32 %v794_v42, %v1186_v45  ;;  %v870_v6 = vadd.f32 %v868_v50, %v859_v49 }
 0x16a   : > { %v771_v21 = vsel %vm580_vm12, %v767_v12, 0.0  ;;  %v810_v32 = vmul.f32 %v808_v11, %v1191_v47  ;;  %v826_v39 = vmul.f32 %v824_v38, %v1189_v46 }
 0x16b   : > { %v745_v56 = vadd.f32 %v743_v10, %v714_v27  ;;  %v777_v17 = vmul.f32 %v1180_v44, %v771_v21  ;;  %v495_v44 = vcombine.low %v1024_v37, %v1026_v43  ;;  %v885_v5 = vpop.permute.xlu1 %884 }
 0x16c   : > { %v812_v23 = vadd.f32 %v810_v32, %v796_v1 }
 0x16d   : > { %v779_v34 = vadd.f32 %v777_v17, %v745_v56  ;;  %v497_v40 = vmul.f32 %v495_v44, %v1383_v30 }
 0x16e   : > { %v828_v30 = vadd.f32 %v826_v39, %v812_v23 }
 0x16f   : > { %v790_v13 = vrot.slane %v779_v34, %v789_v35  ;;  %v804_v52 = vrot.slane %v779_v34, %v803_v59  ;;  %v820_v58 = vrot.slane %v779_v34, %v819_v15  ;;  %v836_v20 = vrot.slane %v779_v34, %v835_v54 }
 0x170   : > { %v877_v31 = vcombine.high %v497_v40, %v497_v40 }
 0x171   : > { %v795_v29 = vmul.f32 %v790_v13, %v1186_v45  ;;  %v809_v28 = vmul.f32 %v804_v52, %v1191_v47  ;;  %v866_v45 = vcombine.high %v1380_v63, %v1380_v63  ;;  %v825_v47 = vmul.f32 %v820_v58, %v1189_v46 }
 0x173   : > { %v811_v36 = vadd.f32 %v809_v28, %v795_v29  ;;  %v869_v53 = vmul.f32 %v866_v45, %v863_v19 }
 0x175   : > { %v827_v24 = vadd.f32 %v825_v47, %v811_v36  ;;  %v871_v4 = vadd.f32 %v869_v53, %v860_v0 }
 0x179   : > { %v831_v9 = vpop.permute.xlu0 %830 }
 0x17a   : > { %v841_v61 = vmul.f32 %v836_v20, %v831_v9  ;;  %v842_v7 = vmul.f32 %v840_v25, %v831_v9 }
 0x17c   : > { %v843_v18 = vadd.f32 %v841_v61, %v827_v24  ;;  %v844_v62 = vadd.f32 %v842_v7, %v828_v30 }
 0x17e   : > { %v874_v46 = vpop.permute.xlu0 %873  ;;  %v887_v48 = vmul.f32 %v885_v5, %v843_v18  ;;  %v888_v22 = vmul.f32 %v885_v5, %v844_v62 }
 0x17f   : > { %v879_v3 = vmul.f32 %v874_v46, %v497_v40  ;;  %v880_v41 = vmul.f32 %v877_v31, %v874_v46 }
 0x181   : > { %v881_v8 = vadd.f32 %v879_v3, %v870_v6  ;;  %v882_v60 = vadd.f32 %v880_v41, %v871_v4 }
 0x183   : > { %v889_v63 = vadd.f32 %v887_v48, %v881_v8  ;;  %v890_v55 = vadd.f32 %v888_v22, %v882_v60 }
 0x185   : > { %v893_v57 = vcombine.low %v889_v63, %v890_v55 }
 0x187   : > { %895 = vst [vmem:[%s197_s22] sm:$0xff] %v893_v57 }
 0x188 PF: > { %s14_s15 = sadd.s32 1, %s1033_s15  }
 0x189   : > { %p11_p4 = scmp.ge.s32.totalorder %s14_s15, 4  }
 0x18b   :  { %13 = sbr.rel (!%p11_p4) target bundleno = 1 (0x1), region = 66 }

// kernel: mixed_op.2
= control target key start
LH: loop header
LB: loop body
LE: loop exit
PB: predicated region body
PF: predicated region fallthrough
CT: control target
= control target key end

     0   :  { %s1053_s12 = smov 0   ;;  %s1499_s0 = inlined_call_operand.vmem [shape: f32[2,4,256], index: 0, kind: input, shape index: {}]   ;;  %s1500_s1 = inlined_call_operand.vmem [shape: f32[4,9], index: 1, kind: input, shape index: {}]   ;;  %s1501_s2 = inlined_call_operand.vmem [shape: f32[4,4], index: 2, kind: input, shape index: {}]   ;;  %s1502_s3 = inlined_call_operand.vmem [shape: f32[2,4,6], index: 3, kind: output, shape index: {}]  }
   0x1 LB: > { %s930_s13 = sadd.s32 4294967295, %s1005_s12   ;;  %p934_p0 = scmp.ge.s32.totalorder %s1005_s12, 1  ;;  %s1005_s12 = sphi %s1053_s12, %s13_s12  }
   0x2   : > { %p137_p1 = scmp.lt.s32.totalorder %s1005_s12, 3 }
   0x4   : > { %p138_p2 = pnand %p934_p0, %p137_p1 }
   0x5   : > { %p160_p3 = scmp.lt.s32.totalorder (!%p138_p2), %s930_s13, 1  ;;  %v469_v0 = vld [vmem:[%s1500_s1] sm:$0xf] (!%p138_p2)  ;;  %v1007_v1 = vmov (!%p138_p2), 4   ;;  %v1008_v2 = vmov (!%p138_p2), 6   ;;  %v1009_v4 = vmov (!%p138_p2), 1   ;;  %v184_v60 = vlaneseq (!%p138_p2) }
   0x6   : > { %141 = sbr.rel (%p138_p2) target bundleno = 531 (0x213), region = 32  ;;  %981 = vset.pattern.permute.xlu1 (!%p138_p2), %v1007_v1  ;;  %986 = vset.pattern.permute.xlu0 (!%p138_p2), %v1008_v2  ;;  %s1010_s20 = smov (!%p138_p2), 48   ;;  %v1011_v5 = vmov (!%p138_p2), 2   ;;  %v1012_v6 = vmov (!%p138_p2), 7   ;;  %v1013_v7 = vmov (!%p138_p2), 3   ;;  %v1014_v8 = vmov (!%p138_p2), 8  }
   0x7   : > { %473 = vperm.xlu1 (!%p138_p2), %981, %v469_v0   ;;  %v1015_v9 = vmov (!%p138_p2), 5   ;;  %v1016_v10 = vmov (!%p138_p2), 0   ;;  %v1077_v11 = vld [vmem:[%s1501_s2] sm:$0xf] (!%p138_p2)  ;;  %vm178_vm0 = vcmask (!%p138_p2), 1043840   ;;  %vm179_vm1 = vcmask (!%p138_p2), 1047556  }
   0x8   : > { %vm174_vm2 = vcmask (!%p138_p2), 392192   ;;  %vm182_vm3 = vcmask (!%p138_p2), 388096   ;;  %vm180_vm4 = vmor (!%p138_p2), %vm179_vm1, %vm178_vm0  ;;  %s1017_s23 = smov (!%p138_p2), 96   ;;  %s1018_s24 = smov (!%p138_p2), 97   ;;  %v1193_v63 = vand.u32 (!%p138_p2), 127, %v184_v60  ;;  %vm210_vm7 = vcmask (!%p138_p2), 793600  }
   0x9   : > { %s1019_s25 = smov (!%p138_p2), 95   ;;  %s1020_s26 = smov (!%p138_p2), 81   ;;  %vm239_vm10 = vcmask (!%p138_p2), 785408   ;;  %vm272_vm13 = vcmask (!%p138_p2), 777216   ;;  %vm301_vm15 = vcmask (!%p138_p2), 662528   ;;  %vm330_vm0 = vcmask (!%p138_p2), 646144  }
   0xa   : > { %s1021_s27 = smov (!%p138_p2), 79   ;;  %s1022_s28 = smov (!%p138_p2), 65   ;;  %v1200_v2 = vadd.s32 (!%p138_p2), 128, %v1193_v63  ;;  %vm191_vm5 = vcmp.ge.s32.totalorder (!%p138_p2), %v1193_v63, 16 }
   0xb   : > { %982 = vset.pattern.permute.xlu1 (!%p138_p2), %v1009_v4  ;;  %s1023_s29 = smov (!%p138_p2), 64   ;;  %s1024_s30 = smov (!%p138_p2), 110  }
   0xc   : > { %544 = vperm.xlu1 (!%p138_p2), %982, %v469_v0   ;;  %s1025_s4 = smov (!%p138_p2), 78   ;;  %s1026_s5 = smov (!%p138_p2), 50   ;;  %vm350_vm1 = vcmp.lt.s32.totalorder (!%p138_p2), %v1200_v2, 240 }
   0xd   : > { %s1516_s13 = smov (!%p160_p3, %s930_s13), 1  ;;  %s1027_s6 = smov 46  }
   0xe   : > { %s946_s16 = sshll.u32 %s1516_s13, 3  ;;  %s1028_s7 = smov 114  }
   0xf   : > { %s164_s19 = scalar_lea.vmem %s1499_s0, %s946_s16  ;;  %s1029_s8 = smov 112  }
  0x10   : > { %v1070_v3 = vld [vmem:[%s164_s19] sm:$0xff]  ;;  %983 = vset.pattern.permute.xlu1 %v1011_v5  ;;  %s1030_s9 = smov 82   ;;  %s1031_s10 = smov 63  }
  0x11   : > { %171 = vrot.lane.b32.xlu0 %v1070_v3, %s1010_s20  ;;  %580 = vperm.xlu1 %983, %v469_v0   ;;  %s937_s11 = sshll.u32 %s1516_s13, 2 }
  0x12   : > { %s168_s16 = scalar_lea.vmem %s1502_s3, %s937_s11 }
  0x15   : > { %680 = vperm.xlu0 %986, %v469_v0   ;;  %984 = vset.pattern.permute.xlu1 %v1013_v7 }
  0x16   : > { %612 = vperm.xlu1 %984, %v469_v0  }
  0x19   : > { %987 = vset.pattern.permute.xlu0 %v1012_v6 }
  0x1a   : > { %711 = vperm.xlu0 %987, %v469_v0   ;;  %985 = vset.pattern.permute.xlu1 %v1015_v9 }
  0x1b   : > { %644 = vperm.xlu1 %985, %v469_v0  }
  0x1e   : > { %988 = vset.pattern.permute.xlu0 %v1014_v8 }
  0x1f   : > { %745 = vperm.xlu0 %988, %v469_v0   ;;  %990 = vset.pattern.permute.xlu1 %v1009_v4  ;;  %v1203_v4 = vand.u32 15, %v1193_v63 }
  0x20   : > { %769 = vperm.xlu1 %990, %v1077_v11  }
  0x21   : > { %vm193_vm6 = vcmp.ge.s32.totalorder %v1203_v4, 1  ;;  %vm258_vm11 = vcmp.le.s32.totalorder %v1203_v4, 14 }
  0x22   : > { %vm195_vm9 = vmand %vm191_vm5, %vm193_vm6 }
  0x23   : > { %989 = vset.pattern.permute.xlu0 %v1016_v10  ;;  %vm260_vm14 = vmand %vm191_vm5, %vm258_vm11 }
  0x24   : > { %512 = vperm.xlu0 %989, %v469_v0   ;;  %992 = vset.pattern.permute.xlu1 %v1013_v7 }
  0x28   : > { %755 = vperm.xlu0 %989, %v1077_v11  }
  0x2c   : > { %991 = vset.pattern.permute.xlu0 %v1011_v5 }
  0x2d   : > { %785 = vperm.xlu0 %991, %v1077_v11  }
  0x31   : > { %993 = vset.pattern.permute.xlu0 %v1013_v7  ;;  %v1210_v7 = vand.u32 15, %v1200_v2 }
  0x33   : > { %vm194_vm8 = vcmp.ge.s32.totalorder %v1210_v7, 1  ;;  %vm259_vm12 = vcmp.le.s32.totalorder %v1210_v7, 14 }
  0x83   : > { %v172_v12 = vpop.permute.xlu0 %171 }
  0x84   : > { %v173_v13 = vrot.slane %v172_v12, 4 }
  0x86   : > { %v175_v14 = vsel %vm174_vm2, %v173_v13, %v172_v12  ;;  %183 = vst.msk [vmem:[#allocation2 + $0x8] sm:$0xf] %vm182_vm3, %v173_v13  ;;  %v1144_v36 = vpop.permute.xlu1 %473  ;;  %vm363_vm3 = vcmask 531456  }
  0x87   : > { %181 = vst.msk [vmem:[#allocation2] sm:$0xff] %vm180_vm4, %v175_v14  ;;  %vm1288_vm4 = vmand %vm350_vm1, %vm194_vm8 }
  0x8b   : > { %v1151_v38 = vpop.permute.xlu1 %544 }
  0x8d   : > { %v1083_v15 = vld [vmem:[#allocation2 + $0x8] sm:$0xf] }
  0x8e   : > { %237 = vrot.lane.b32.xlu1 %v1083_v15, %s1017_s23  ;;  %208 = vrot.lane.b32.xlu0 %v1083_v15, %s1018_s24  ;;  %v1089_v16 = vld [vmem:[#allocation2] sm:$0xff]  ;;  %v556_v17 = vld [vmem:[#allocation2 + $0x8] sm:$0xf] }
  0x8f   : > { %v558_v18 = vmax.f32 %v556_v17, 0.0  ;;  %v620_v19 = vld [vmem:[#allocation2 + $0x8] sm:$0xf]  ;;  %v203_v27 = vcombine.high %v1089_v16, %v1089_v16  ;;  %v557_v30 = vmax.f32 %v1089_v16, 0.0 }
  0x90   : > { %v622_v20 = vmax.f32 %v620_v19, 0.0  ;;  %v656_v21 = vld [vmem:[#allocation2 + $0x8] sm:$0xf]  ;;  %v1156_v40 = vpop.permute.xlu1 %580 }
  0x91   : > { %v658_v22 = vmax.f32 %v656_v21, 0.0  ;;  %v721_v23 = vld [vmem:[#allocation2 + $0x8] sm:$0xf]  ;;  %v565_v35 = vcombine.high %v557_v30, %v557_v30 }
  0x92   : > { %270 = vrot.lane.b32.xlu0 %v1083_v15, %s1019_s25  ;;  %233 = vrot.lane.b32.xlu1 %v1089_v16, %s1017_s23  ;;  %v723_v24 = vmax.f32 %v721_v23, 0.0  ;;  %v488_v25 = vld [vmem:[#allocation2 + $0x8] sm:$0xf] }
  0x93   : > { %v490_v26 = vmax.f32 %v488_v25, 0.0  ;;  %v520_v28 = vld [vmem:[#allocation2 + $0x8] sm:$0xf] }
  0x94   : > { %v522_v29 = vmax.f32 %v520_v28, 0.0  ;;  %v588_v31 = vld [vmem:[#allocation2 + $0x8] sm:$0xf]  ;;  %v1146_v37 = vpop.permute.xlu0 %680 }
  0x95   : > { %v590_v32 = vmax.f32 %v588_v31, 0.0  ;;  %v688_v33 = vld [vmem:[#allocation2 + $0x8] sm:$0xf]  ;;  %v1162_v42 = vpop.permute.xlu1 %612 }
  0x96   : > { %299 = vrot.lane.b32.xlu0 %v1083_v15, %s1020_s26  ;;  %266 = vrot.lane.b32.xlu1 %v1089_v16, %s1019_s25  ;;  %v690_v34 = vmax.f32 %v688_v33, 0.0 }
  0x99   : > { %v1153_v39 = vpop.permute.xlu0 %711 }
  0x9a   : > { %328 = vrot.lane.b32.xlu0 %v1083_v15, %s1021_s27  ;;  %295 = vrot.lane.b32.xlu1 %v1089_v16, %s1020_s26  ;;  %v1167_v44 = vpop.permute.xlu1 %644 }
  0x9e   : > { %361 = vrot.lane.b32.xlu0 %v1083_v15, %s1022_s28  ;;  %386 = vrot.lane.b32.xlu1 %v1089_v16, %s1023_s29  ;;  %v1158_v41 = vpop.permute.xlu0 %745 }
  0x9f   : > { %v1172_v46 = vpop.permute.xlu1 %769 }
  0xa2   : > { %390 = vrot.lane.b32.xlu0 %v1083_v15, %s1023_s29  ;;  %570 = vrot.lane.b32.xlu1 %v558_v18, %s1024_s30 }
  0xa3   : > { %v1164_v43 = vpop.permute.xlu0 %512 }
  0xa6   : > { %634 = vrot.lane.b32.xlu1 %v622_v20, %s1025_s4  ;;  %204 = vrot.lane.b32.xlu0 %v1089_v16, %s1018_s24 }
  0xa7   : > { %v1169_v45 = vpop.permute.xlu0 %755 }
  0xaa   : > { %670 = vrot.lane.b32.xlu1 %v658_v22, %s1026_s5  ;;  %324 = vrot.lane.b32.xlu0 %v1089_v16, %s1021_s27 }
  0xac   : > { %v1174_v47 = vpop.permute.xlu0 %785 }
  0xae   : > { %735 = vrot.lane.b32.xlu1 %v723_v24, %s1027_s6  ;;  %357 = vrot.lane.b32.xlu0 %v1089_v16, %s1022_s28 }
  0xb2   : > { %502 = vrot.lane.b32.xlu0 %v490_v26, %s1028_s7  ;;  %206 = vrot.lane.b32.xlu1 %v203_v27, %s1018_s24 }
  0xb6   : > { %534 = vrot.lane.b32.xlu0 %v522_v29, %s1029_s8  ;;  %566 = vrot.lane.b32.xlu1 %v557_v30, %s1024_s30 }
  0xba   : > { %602 = vrot.lane.b32.xlu0 %v590_v32, %s1030_s9  ;;  %235 = vrot.lane.b32.xlu1 %v203_v27, %s1017_s23 }
  0xbe   : > { %702 = vrot.lane.b32.xlu0 %v690_v34, %s1010_s20  ;;  %268 = vrot.lane.b32.xlu1 %v203_v27, %s1019_s25 }
  0xc2   : > { %498 = vrot.lane.b32.xlu0 %v557_v30, %s1028_s7  ;;  %630 = vrot.lane.b32.xlu1 %v557_v30, %s1025_s4 }
  0xc6   : > { %530 = vrot.lane.b32.xlu0 %v557_v30, %s1029_s8  ;;  %297 = vrot.lane.b32.xlu1 %v203_v27, %s1020_s26 }
  0xca   : > { %598 = vrot.lane.b32.xlu0 %v557_v30, %s1030_s9  ;;  %666 = vrot.lane.b32.xlu1 %v557_v30, %s1026_s5 }
  0xce   : > { %568 = vrot.lane.b32.xlu0 %v565_v35, %s1024_s30  ;;  %326 = vrot.lane.b32.xlu1 %v203_v27, %s1021_s27 }
  0xd2   : > { %632 = vrot.lane.b32.xlu0 %v565_v35, %s1025_s4  ;;  %698 = vrot.lane.b32.xlu1 %v557_v30, %s1010_s20 }
  0xd6   : > { %668 = vrot.lane.b32.xlu0 %v565_v35, %s1026_s5  ;;  %359 = vrot.lane.b32.xlu1 %v203_v27, %s1022_s28 }
  0xda   : > { %733 = vrot.lane.b32.xlu0 %v565_v35, %s1027_s6  ;;  %731 = vrot.lane.b32.xlu1 %v557_v30, %s1027_s6 }
  0xde   : > { %421 = vrot.lane.b32.xlu0 %v1083_v15, %s1031_s10  ;;  %388 = vrot.lane.b32.xlu1 %v203_v27, %s1023_s29 }
  0xe2   : > { %500 = vrot.lane.b32.xlu1 %v565_v35, %s1028_s7 }
  0xe6   : > { %532 = vrot.lane.b32.xlu1 %v565_v35, %s1029_s8 }
  0xea   : > { %600 = vrot.lane.b32.xlu1 %v565_v35, %s1030_s9 }
  0xee   : > { %417 = vrot.lane.b32.xlu1 %v1089_v16, %s1031_s10 }
  0xf2   : > { %700 = vrot.lane.b32.xlu1 %v565_v35, %s1010_s20 }
  0xf6   : > { %419 = vrot.lane.b32.xlu1 %v203_v27, %s1031_s10 }
  0xfa   : > { %801 = vperm.xlu1 %992, %v1077_v11  }
 0x100   : > { %v238_v48 = vpop.permute.xlu1 %237  ;;  %v209_v49 = vpop.permute.xlu0 %208 }
 0x104   : > { %v234_v50 = vpop.permute.xlu1 %233  ;;  %v271_v51 = vpop.permute.xlu0 %270 }
 0x108   : > { %v267_v52 = vpop.permute.xlu1 %266  ;;  %v1176_v53 = vpop.permute.xlu0 %299 }
 0x10c   : > { %v1178_v54 = vpop.permute.xlu1 %295  ;;  %v1180_v55 = vpop.permute.xlu0 %328 }
 0x110   : > { %v1182_v56 = vpop.permute.xlu1 %386  ;;  %v1184_v57 = vpop.permute.xlu0 %361 }
 0x114   : > { %v1186_v58 = vpop.permute.xlu1 %570  ;;  %v1188_v59 = vpop.permute.xlu0 %390 }
 0x118   : > { %v1190_v61 = vpop.permute.xlu1 %634  ;;  %v205_v62 = vpop.permute.xlu0 %204 }
 0x11c   : > { %v1195_v0 = vpop.permute.xlu1 %670  ;;  %v1197_v1 = vpop.permute.xlu0 %324 }
 0x120   : > { %v1205_v5 = vpop.permute.xlu1 %735  ;;  %v1207_v6 = vpop.permute.xlu0 %357 }
 0x124   : > { %v207_v8 = vpop.permute.xlu1 %206  ;;  %v1214_v9 = vpop.permute.xlu0 %502 }
 0x125   : > { %v211_v10 = vsel %vm210_vm7, %v205_v62, %v207_v8  ;;  %v212_v11 = vsel %vm210_vm7, %v207_v8, %v209_v49  ;;  %vm392_vm7 = vcmask 523264  }
 0x126   : > { %v215_v12 = vsel %vm195_vm9, %v211_v10, -inf  ;;  %v216_v13 = vsel %vm194_vm8, %v212_v11, -inf  ;;  %v222_v14 = vsel %vm195_vm9, %v211_v10, 0.0  ;;  %v223_v15 = vsel %vm194_vm8, %v212_v11, 0.0 }
 0x127   : > { %v219_v18 = vcombine.low %v215_v12, %v216_v13  ;;  %v226_v19 = vcombine.low %v222_v14, %v223_v15  ;;  %vm572_vm9 = vcmask 900096  }
 0x128   : > { %v1225_v16 = vpop.permute.xlu1 %566  ;;  %v1227_v17 = vpop.permute.xlu0 %534 }
 0x129   : > { %v221_v26 = vmax.f32 %v1070_v3, %v219_v18  ;;  %v228_v27 = vadd.f32 %v226_v19, %v1070_v3 }
 0x12c   : > { %v236_v20 = vpop.permute.xlu1 %235  ;;  %v1234_v25 = vpop.permute.xlu0 %602 }
 0x12d   : > { %v240_v21 = vsel %vm239_vm10, %v234_v50, %v236_v20  ;;  %v241_v22 = vsel %vm239_vm10, %v236_v20, %v238_v48  ;;  %vm636_vm10 = vcmask 637952  }
 0x12e   : > { %v244_v23 = vsel %vm191_vm5, %v240_v21, -inf  ;;  %v251_v24 = vsel %vm191_vm5, %v240_v21, 0.0 }
 0x12f   : > { %v248_v28 = vcombine.low %v244_v23, %v241_v22  ;;  %v255_v29 = vcombine.low %v251_v24, %v241_v22 }
 0x130   : > { %v269_v30 = vpop.permute.xlu1 %268  ;;  %v1247_v10 = vpop.permute.xlu0 %702 }
 0x131   : > { %v250_v31 = vmax.f32 %v221_v26, %v248_v28  ;;  %v257_v32 = vadd.f32 %v255_v29, %v228_v27  ;;  %v273_v33 = vsel %vm272_vm13, %v267_v52, %v269_v30  ;;  %v274_v34 = vsel %vm272_vm13, %v269_v30, %v271_v51 }
 0x132   : > { %v277_v35 = vsel %vm260_vm14, %v273_v33, -inf  ;;  %v278_v48 = vsel %vm259_vm12, %v274_v34, -inf  ;;  %v284_v49 = vsel %vm260_vm14, %v273_v33, 0.0  ;;  %v285_v50 = vsel %vm259_vm12, %v274_v34, 0.0 }
 0x133   : > { %v281_v62 = vcombine.low %v277_v35, %v278_v48  ;;  %v288_v8 = vcombine.low %v284_v49, %v285_v50  ;;  %v470_v28 = vmax.f32 %v1070_v3, 0.0  ;;  %v1032_v29 = vmov 0.0  }
 0x134   : > { %v1249_v11 = vpop.permute.xlu1 %630  ;;  %v1253_v15 = vpop.permute.xlu0 %498  ;;  %v938_v30 = vsel %vm191_vm5, 1.0, %v1032_v29  ;;  %v940_v3 = vsel %vm193_vm6, 1.0, %v1032_v29  ;;  %v941_v49 = vsel %vm194_vm8, 1.0, %v1032_v29  ;;  %vm481_vm5 = vcmp.ge.s32.totalorder %v1193_v63, 32 }
 0x135   : > { %v283_v12 = vmax.f32 %v250_v31, %v281_v62  ;;  %v290_v13 = vadd.f32 %v288_v8, %v257_v32  ;;  %v477_v33 = vcombine.high %v470_v28, %v470_v28  ;;  %v444_v34 = vadd.f32 1.0, %v938_v30 }
 0x136   : > { %v1282_v62 = vmul.f32 %v1144_v36, %v470_v28  ;;  %vm483_vm13 = vcmp.ge.s32.totalorder %v1203_v4, 2  ;;  %vm504_vm14 = vcmask 932864  }
 0x138   : > { %v298_v14 = vpop.permute.xlu1 %297  ;;  %v1265_v26 = vpop.permute.xlu0 %530 }
 0x139   : > { %v302_v51 = vsel %vm301_vm15, %v1178_v54, %v298_v14  ;;  %v303_v52 = vsel %vm301_vm15, %v298_v14, %v1176_v53  ;;  %vm1335_vm15 = vmand %vm481_vm5, %vm483_vm13 }
 0x13a   : > { %v306_v18 = vsel %vm193_vm6, %v302_v51, -inf  ;;  %v307_v19 = vsel %vm194_vm8, %v303_v52, -inf  ;;  %v313_v20 = vsel %vm193_vm6, %v302_v51, 0.0  ;;  %v314_v21 = vsel %vm194_vm8, %v303_v52, 0.0 }
 0x13b   : > { %v310_v22 = vcombine.low %v306_v18, %v307_v19  ;;  %v317_v23 = vcombine.low %v313_v20, %v314_v21  ;;  %v1303_v52 = vmul.f32 %v477_v33, %v1144_v36  ;;  %v448_v18 = vadd.f32 1.0, %v444_v34 }
 0x13c   : > { %v1263_v24 = vpop.permute.xlu1 %666  ;;  %v1272_v32 = vpop.permute.xlu0 %598  ;;  %v452_v19 = vadd.f32 1.0, %v940_v3  ;;  %v943_v36 = vsel %vm259_vm12, 1.0, %v1032_v29  ;;  %v939_v33 = vsel %vm350_vm1, 1.0, %v1032_v29  ;;  %v942_v34 = vsel %vm258_vm11, 1.0, %v1032_v29 }
 0x13d   : > { %v312_v54 = vmax.f32 %v283_v12, %v310_v22  ;;  %v319_v53 = vadd.f32 %v317_v23, %v290_v13  ;;  %vm552_vm8 = vcmp.le.s32.totalorder %v1210_v7, 13  ;;  %v449_v3 = vadd.f32 2.0, %v939_v33 }
 0x140   : > { %v327_v27 = vpop.permute.xlu1 %326  ;;  %v569_v20 = vpop.permute.xlu0 %568 }
 0x141   : > { %v331_v35 = vsel %vm330_vm0, %v1197_v1, %v327_v27  ;;  %v332_v48 = vsel %vm330_vm0, %v327_v27, %v1180_v55  ;;  %vm484_vm0 = vcmp.ge.s32.totalorder %v1210_v7, 2 }
 0x142   : > { %v335_v12 = vsel %vm258_vm11, %v331_v35, -inf  ;;  %v336_v13 = vsel %vm259_vm12, %v332_v48, -inf  ;;  %v342_v14 = vsel %vm258_vm11, %v331_v35, 0.0  ;;  %v343_v51 = vsel %vm259_vm12, %v332_v48, 0.0 }
 0x143   : > { %v339_v28 = vcombine.low %v335_v12, %v336_v13  ;;  %v346_v30 = vcombine.low %v342_v14, %v343_v51  ;;  %v456_v51 = vadd.f32 %v942_v34, %v452_v19 }
 0x144   : > { %v1270_v31 = vpop.permute.xlu1 %698  ;;  %v633_v12 = vpop.permute.xlu0 %632 }
 0x145   : > { %v341_v8 = vmax.f32 %v312_v54, %v339_v28  ;;  %v574_v54 = vsel %vm572_vm9, %v569_v20, %v1186_v58  ;;  %v458_v33 = vmul.f32 %v456_v51, %v448_v18  ;;  %v637_v18 = vsel %vm636_vm10, %v1249_v11, %v633_v12 }
 0x148   : > { %v360_v50 = vpop.permute.xlu1 %359 }
 0x149   : > { %v364_v55 = vsel %vm363_vm3, %v1207_v6, %v360_v50  ;;  %v365_v1 = vsel %vm363_vm3, %v360_v50, %v1184_v57  ;;  %v453_v6 = vadd.f32 1.0, %v941_v49 }
 0x14a   : > { %v368_v57 = vsel %vm193_vm6, %v364_v55, -inf  ;;  %v369_v21 = vsel %vm1288_vm4, %v365_v1, -inf  ;;  %v375_v22 = vsel %vm193_vm6, %v364_v55, 0.0  ;;  %v376_v23 = vsel %vm1288_vm4, %v365_v1, 0.0 }
 0x14b   : > { %vm551_vm6 = vcmp.le.s32.totalorder %v1203_v4, 13  ;;  %v372_v35 = vcombine.low %v368_v57, %v369_v21  ;;  %v379_v48 = vcombine.low %v375_v22, %v376_v23  ;;  %v457_v49 = vadd.f32 %v943_v36, %v453_v6 }
 0x14c   : > { %v1313_v27 = vpop.permute.xlu1 %731  ;;  %v348_v55 = vadd.f32 %v346_v30, %v319_v53  ;;  %vm1348_vm3 = vmand %vm481_vm5, %vm551_vm6  ;;  %vm536_vm4 = vcmask 916480  }
 0x14d   : > { %v374_v57 = vmax.f32 %v341_v8, %v372_v35  ;;  %v459_v53 = vmul.f32 %v457_v49, %v449_v3 }
 0x14e   : > { %v381_v6 = vadd.f32 %v379_v48, %v348_v55  ;;  %v669_v48 = vpop.permute.xlu0 %668 }
 0x14f   : > { %995 = vrcp.f32 %v459_v53 }
 0x150   : > { %v389_v50 = vpop.permute.xlu1 %388  ;;  %997 = vrcp.f32 %v458_v33 }
 0x151   : > { %v393_v29 = vsel %vm392_vm7, %v1182_v56, %v389_v50  ;;  %v394_v1 = vsel %vm392_vm7, %v389_v50, %v1188_v59  ;;  %v573_v59 = vsel %vm572_vm9, %v1225_v16, %v569_v20  ;;  %vm652_vm7 = vcmp.lt.s32.totalorder %v1200_v2, 224 }
 0x152   : > { %v398_v13 = vsel %vm350_vm1, %v394_v1, -inf  ;;  %v405_v14 = vsel %vm350_vm1, %v394_v1, 0.0  ;;  %vm672_vm9 = vcmask 408576   ;;  %v638_v1 = vsel %vm636_vm10, %v633_v12, %v1190_v61  ;;  %vm1423_vm10 = vmand %vm652_vm7, %vm552_vm8 }
 0x153   : > { %v401_v21 = vcombine.low %v393_v29, %v398_v13  ;;  %v408_v22 = vcombine.low %v393_v29, %v405_v14  ;;  %v673_v13 = vsel %vm672_vm9, %v1263_v24, %v669_v48  ;;  %v642_v24 = vsel %vm552_vm8, %v638_v1, 0.0 }
 0x154   : > { %v501_v19 = vpop.permute.xlu1 %500  ;;  %v677_v56 = vsel %vm483_vm13, %v673_v13, 0.0 }
 0x155   : > { %v1352_v36 = vmax.f32 %v374_v57, %v401_v21  ;;  %v1354_v28 = vadd.f32 %v408_v22, %v381_v6  ;;  %v505_v16 = vsel %vm504_vm14, %v1253_v15, %v501_v19  ;;  %v506_v58 = vsel %vm504_vm14, %v501_v19, %v1214_v9  ;;  %v734_v57 = vpop.permute.xlu0 %733 }
 0x156   : > { %v509_v20 = vsel %vm1335_vm15, %v505_v16, 0.0  ;;  %v510_v30 = vsel %vm484_vm0, %v506_v58, 0.0  ;;  %v577_v15 = vsel %vm1348_vm3, %v573_v59, 0.0  ;;  %v578_v9 = vsel %vm552_vm8, %v574_v54, 0.0  ;;  %vm1448_vm8 = vmand %vm350_vm1, %vm259_vm12 }
 0x157   : > { %v515_v34 = vmul.f32 %v1164_v43, %v509_v20  ;;  %v516_v35 = vmul.f32 %v1164_v43, %v510_v30  ;;  %vm737_vm14 = vcmask 375808   ;;  %vm604_vm15 = vcmask 670720  }
 0x158   : > { %v533_v3 = vpop.permute.xlu1 %532  ;;  %v583_v29 = vmul.f32 %v1156_v40, %v577_v15  ;;  %v648_v19 = vmul.f32 %v1167_v44, %v642_v24  ;;  %v738_v23 = vsel %vm737_vm14, %v1313_v27, %v734_v57  ;;  %v683_v30 = vmul.f32 %v1146_v37, %v677_v56 }
 0x159   : > { %v518_v49 = vadd.f32 %v516_v35, %v1303_v52  ;;  %v537_v50 = vsel %vm536_vm4, %v1265_v26, %v533_v3  ;;  %v538_v8 = vsel %vm536_vm4, %v533_v3, %v1227_v17  ;;  %v517_v11 = vadd.f32 %v515_v34, %v1282_v62  ;;  %v996_v20 = vpop.eup %995 }
 0x15a   : > { %v541_v43 = vsel %vm481_vm5, %v537_v50, 0.0  ;;  %v548_v55 = vmul.f32 %v1151_v38, %v538_v8  ;;  %v584_v26 = vmul.f32 %v1156_v40, %v578_v9  ;;  %v641_v17 = vsel %vm551_vm6, %v637_v18, 0.0  ;;  %vm1393_vm5 = vmand %vm652_vm7, %vm484_vm0  ;;  %v998_v35 = vpop.eup %997 }
 0x15b   : > { %v547_v52 = vmul.f32 %v1151_v38, %v541_v43  ;;  %v674_v38 = vsel %vm672_vm9, %v669_v48, %v1195_v0  ;;  %v742_v15 = vsel %vm551_vm6, %v738_v23, 0.0  ;;  %vm423_vm6 = vcmask 515072   ;;  %v422_v43 = vpop.permute.xlu0 %421 }
 0x15c   : > { %v550_v14 = vadd.f32 %v548_v55, %v518_v49  ;;  %v601_v51 = vpop.permute.xlu1 %600  ;;  %v678_v54 = vsel %vm1393_vm5, %v674_v38, 0.0  ;;  %vm865_vm12 = vcmp.eq.s32.totalorder %v1193_v63, 1  ;;  %vm867_vm1 = vcmp.eq.s32.totalorder %v1193_v63, 2 }
 0x15d   : > { %v549_v40 = vadd.f32 %v547_v52, %v517_v11  ;;  %v605_v62 = vsel %vm604_vm15, %v1272_v32, %v601_v51  ;;  %v606_v12 = vsel %vm604_vm15, %v601_v51, %v1234_v25  ;;  %v647_v25 = vmul.f32 %v1167_v44, %v641_v17 }
 0x15e   : > { %v586_v6 = vadd.f32 %v584_v26, %v550_v14  ;;  %v609_v21 = vsel %vm483_vm13, %v605_v62, 0.0  ;;  %v610_v22 = vsel %vm484_vm0, %v606_v12, 0.0  ;;  %v684_v33 = vmul.f32 %v1146_v37, %v678_v54 }
 0x15f   : > { %v585_v0 = vadd.f32 %v583_v29, %v549_v40  ;;  %v615_v59 = vmul.f32 %v1162_v42, %v609_v21  ;;  %v616_v32 = vmul.f32 %v1162_v42, %v610_v22  ;;  %v739_v44 = vsel %vm737_vm14, %v734_v57, %v1205_v5 }
 0x160   : > { %v418_v53 = vpop.permute.xlu1 %417  ;;  %v1432_v37 = vshrl.u32 %v184_v60, 7  ;;  %v743_v5 = vsel %vm1423_vm10, %v739_v44, 0.0  ;;  %vm869_vm13 = vcmp.eq.s32.totalorder %v1193_v63, 3  ;;  %vm871_vm0 = vcmp.eq.s32.totalorder %v1193_v63, 4 }
 0x161   : > { %v617_v16 = vadd.f32 %v615_v59, %v585_v0  ;;  %v618_v58 = vadd.f32 %v616_v32, %v586_v6  ;;  %v749_v52 = vmul.f32 %v1158_v41, %v743_v5  ;;  %vm873_vm3 = vcmp.eq.s32.totalorder %v1193_v63, 5 }
 0x162   : > { %v760_v1 = vsub.s32 0, %v1432_v37  ;;  %v774_v11 = vsub.s32 1, %v1432_v37  ;;  %v790_v4 = vsub.s32 2, %v1432_v37  ;;  %v806_v44 = vsub.s32 3, %v1432_v37 }
 0x163   : > { %v649_v34 = vadd.f32 %v647_v25, %v617_v16  ;;  %v650_v27 = vadd.f32 %v648_v19, %v618_v58  ;;  %vm875_vm4 = vcmask 44032  }
 0x164   : > { %v701_v9 = vpop.permute.xlu1 %700 }
 0x165   : > { %v685_v48 = vadd.f32 %v683_v30, %v649_v34  ;;  %v686_v3 = vadd.f32 %v684_v33, %v650_v27  ;;  %v704_v18 = vsel %vm174_vm2, %v1270_v31, %v701_v9  ;;  %v705_v49 = vsel %vm174_vm2, %v701_v9, %v1247_v10 }
 0x166   : > { %v709_v50 = vsel %vm652_vm7, %v705_v49, 0.0  ;;  %v714_v8 = vmul.f32 %v1153_v39, %v704_v18  ;;  %v748_v10 = vmul.f32 %v1158_v41, %v742_v15  ;;  %v466_v41 = vcombine.low %v998_v35, %v996_v20 }
 0x167   : > { %v715_v60 = vmul.f32 %v1153_v39, %v709_v50  ;;  %vm819_vm2 = vcmask 1043456  }
 0x168   : > { %v716_v55 = vadd.f32 %v714_v8, %v685_v48  ;;  %v420_v29 = vpop.permute.xlu1 %419 }
 0x169   : > { %v717_v39 = vadd.f32 %v715_v60, %v686_v3  ;;  %v424_v26 = vsel %vm423_vm6, %v418_v53, %v420_v29  ;;  %v425_v7 = vsel %vm423_vm6, %v420_v29, %v422_v43 }
 0x16a   : > { %v750_v17 = vadd.f32 %v748_v10, %v716_v55  ;;  %v428_v2 = vsel %vm258_vm11, %v424_v26, -inf  ;;  %v429_v13 = vsel %vm1448_vm8, %v425_v7, -inf  ;;  %v435_v14 = vsel %vm258_vm11, %v424_v26, 0.0 }
 0x16b   : > { %v751_v51 = vadd.f32 %v749_v52, %v717_v39  ;;  %v432_v61 = vcombine.low %v428_v2, %v429_v13  ;;  %v436_v38 = vsel %vm1448_vm8, %v425_v7, 0.0  ;;  %vm863_vm11 = vcmp.eq.s32.totalorder %v1193_v63, 0 }
 0x16c   : > { %v439_v40 = vcombine.low %v435_v14, %v436_v38  ;;  %v761_v62 = vrot.slane %v750_v17, %v760_v1  ;;  %v775_v24 = vrot.slane %v750_v17, %v774_v11  ;;  %v791_v20 = vrot.slane %v750_v17, %v790_v4 }
 0x16d   : > { %v434_v12 = vmax.f32 %v1352_v36, %v432_v61  ;;  %v765_v6 = vrot.slane %v751_v51, %v760_v1  ;;  %v779_v21 = vrot.slane %v751_v51, %v774_v11  ;;  %v795_v34 = vrot.slane %v751_v51, %v790_v4 }
 0x16e   : > { %v441_v57 = vadd.f32 %v439_v40, %v1354_v28  ;;  %v766_v59 = vmul.f32 %v761_v62, %v1169_v45  ;;  %v780_v36 = vmul.f32 %v775_v24, %v1172_v46  ;;  %v796_v9 = vmul.f32 %v791_v20, %v1174_v47 }
 0x16f   : > { %v817_v22 = vcombine.high %v434_v12, %v434_v12  ;;  %v825_v56 = vmul.f32 %v434_v12, %v434_v12  ;;  %v820_v32 = vsel %vm819_vm2, %v434_v12, 0.0  ;;  %v767_v28 = vmul.f32 %v765_v6, %v1169_v45 }
 0x170   : > { %v468_v0 = vmul.f32 %v466_v41, %v441_v57  ;;  %v781_v23 = vmul.f32 %v779_v21, %v1172_v46  ;;  %v782_v35 = vadd.f32 %v780_v36, %v766_v59  ;;  %v797_v3 = vmul.f32 %v795_v34, %v1174_v47 }
 0x171   : > { %v821_v25 = vsel %vm819_vm2, %v817_v22, 0.0  ;;  %v827_v54 = vcombine.high %v825_v56, %v825_v56  ;;  %v829_v16 = vsel %vm819_vm2, %v825_v56, 0.0  ;;  %v807_v18 = vrot.slane %v750_v17, %v806_v44 }
 0x172   : > { %v822_v53 = vadd.f32 %v821_v25, %v820_v32  ;;  %v835_v19 = vcombine.high %v468_v0, %v468_v0  ;;  %v842_v30 = vmul.f32 %v468_v0, %v468_v0  ;;  %v837_v27 = vsel %vm819_vm2, %v468_v0, 0.0 }
 0x173   : > { %v830_v58 = vsel %vm819_vm2, %v827_v54, 0.0  ;;  %v783_v46 = vadd.f32 %v781_v23, %v767_v28  ;;  %v811_v49 = vrot.slane %v751_v51, %v806_v44  ;;  %v798_v50 = vadd.f32 %v796_v9, %v782_v35 }
 0x174   : > { %823 = vadd.xlane.f32.xlu0 %v822_v53  ;;  %v831_v33 = vadd.f32 %v830_v58, %v829_v16  ;;  %v838_v42 = vsel %vm819_vm2, %v835_v19, 0.0  ;;  %v844_v15 = vcombine.high %v842_v30, %v842_v30  ;;  %v846_v37 = vsel %vm819_vm2, %v842_v30, 0.0 }
 0x175   : > { %v839_v45 = vadd.f32 %v838_v42, %v837_v27  ;;  %v799_v8 = vadd.f32 %v797_v3, %v783_v46 }
 0x176   : > { %832 = vadd.xlane.f32.xlu1 %v831_v33  ;;  %v847_v48 = vsel %vm819_vm2, %v844_v15, 0.0 }
 0x177   : > { %v848_v10 = vadd.f32 %v847_v48, %v846_v37 }
 0x178   : > { %840 = vadd.xlane.f32.xlu0 %v839_v45 }
 0x179   : > { %v802_v5 = vpop.permute.xlu1 %801 }
 0x17a   : > { %v812_v60 = vmul.f32 %v807_v18, %v802_v5  ;;  %v813_v31 = vmul.f32 %v811_v49, %v802_v5 }
 0x17c   : > { %v814_v43 = vadd.f32 %v812_v60, %v798_v50  ;;  %v815_v55 = vadd.f32 %v813_v31, %v799_v8  ;;  %849 = vadd.xlane.f32.xlu0 %v848_v10 }
 0x17e   : > { %v851_v29 = vsel %vm819_vm2, %v814_v43, 0.0  ;;  %v852_v1 = vsel %vm819_vm2, %v815_v55, 0.0  ;;  %v856_v11 = vmul.f32 %v814_v43, %v814_v43  ;;  %v857_v52 = vmul.f32 %v815_v55, %v815_v55 }
 0x17f   : > { %v853_v47 = vadd.f32 %v852_v1, %v851_v29 }
 0x180   : > { %v858_v39 = vsel %vm819_vm2, %v856_v11, 0.0  ;;  %v859_v26 = vsel %vm819_vm2, %v857_v52, 0.0 }
 0x181   : > { %854 = vadd.xlane.f32.xlu1 %v853_v47  ;;  %v860_v7 = vadd.f32 %v859_v26, %v858_v39 }
 0x183   : > { %861 = vadd.xlane.f32.xlu0 %v860_v7 }
 0x201   : > { %v824_v17 = vpop.xlane.xlu0 %823 }
 0x202   : > { %v864_v13 = vsel %vm863_vm11, %v824_v17, 0.0 }
 0x203   : > { %v833_v14 = vpop.xlane.xlu1 %832 }
 0x204   : > { %v866_v51 = vsel %vm865_vm12, %v833_v14, %v864_v13 }
 0x205   : > { %v841_v2 = vpop.xlane.xlu0 %840 }
 0x206   : > { %v868_v38 = vsel %vm867_vm1, %v841_v2, %v866_v51 }
 0x209   : > { %v850_v61 = vpop.xlane.xlu0 %849 }
 0x20a   : > { %v870_v40 = vsel %vm869_vm13, %v850_v61, %v868_v38 }
 0x20e   : > { %v855_v41 = vpop.xlane.xlu1 %854 }
 0x20f   : > { %v872_v62 = vsel %vm871_vm0, %v855_v41, %v870_v40 }
 0x210   : > { %v862_v12 = vpop.xlane.xlu0 %861 }
 0x211   : > { %v874_v24 = vsel %vm873_vm3, %v862_v12, %v872_v62 }
 0x212   : > { %876 = vst.msk [vmem:[%s168_s16] sm:$0xf] %vm875_vm4, %v874_v24 }
 0x213 PF: > { %s13_s12 = sadd.s32 1, %s1005_s12  }
 0x214   : > { %p10_p4 = scmp.ge.s32.totalorder %s13_s12, 4  }
 0x216   :  { %12 = sbr.rel (!%p10_p4) target bundleno = 1 (0x1), region = 62 }

</bundles_post_ra>
